<compile_context>
chip_gen: v7x
topology: tpu7x:2x2x1
jax: 0.10.0
libtpu: 0.0.40
codegen_flags: <defaults>
</compile_context>

<pallas_src>
import functools

import numpy as np
import jax
import jax.numpy as jnp
from jax import lax
from jax.experimental import pallas as pl
from jax.experimental.pallas import tpu as pltpu

ALPHA = 1e-6


# --------------------------------------------------------------------------
# Fused kernel: block-diagonal MLP (3 matmuls) + L assembly + C = L L^T + aI
# --------------------------------------------------------------------------
def fused_kernel(x_ref,
                 w1_ref, b1_ref, w2_ref, b2_ref, w3_ref, b3_ref, e_ref,
                 l_ref, c_ref,
                 l3_sc,
                 *, seq_len):
    S = seq_len
    SS = S * S
    TB = x_ref.shape[0]

    x = x_ref[...]                                                    # (TB, S*X)

    # ---- fused block-diagonal MLP: one matmul per layer for BOTH heads
    h = jnp.maximum(jnp.dot(x, w1_ref[...], preferred_element_type=jnp.float32)
                    + b1_ref[...], 0.0)                               # (TB, 2H)
    h = jnp.maximum(jnp.dot(h, w2_ref[...], preferred_element_type=jnp.float32)
                    + b2_ref[...], 0.0)                               # (TB, 2H)
    o = jnp.dot(h, w3_ref[...], preferred_element_type=jnp.float32) + b3_ref[...]
    # o columns: [ strict-lower(M) | strict-upper(M^T) | d-logits ]   (masks folded in W3)

    d = jnp.exp(o[:, 2 * SS:])                                        # (TB, S)
    diag_flat = jnp.dot(d, e_ref[...],
                        preferred_element_type=jnp.float32)           # (TB, SS) exp(d) on diag

    l_flat = o[:, :SS] + diag_flat          # L[b,i,j]  at lane i*S+j (lane-dense)
    lt_flat = o[:, SS:2 * SS] + diag_flat   # L[b,j,k]  at lane k*S+j (transposed layout)

    l_ref[...] = l_flat                     # single dense store of L

    # ---- materialize L as (TB,S,S) via VMEM scratch (lane -> (sublane,lane) conversion)
    for i in range(S):
        l3_sc[:, i:i + 1, :] = l_flat[:, i * S:(i + 1) * S][:, None, :]
    L3 = l3_sc[...]                                                   # (TB, S, S)

    # ---- C = L @ L^T + alpha*I
    row = lax.broadcasted_iota(jnp.int32, (S, S), 0)
    col = lax.broadcasted_iota(jnp.int32, (S, S), 1)
    eye = (row == col).astype(jnp.float32)[None, :, :]                # (1, S, S)

    if S <= 32:
        # unrolled VPU outer-product accumulation over the contraction index k;
        # keeps the MXU free for the MLP matmuls of neighbouring pipeline stages.
        acc = jnp.zeros((TB, S, S), jnp.float32)
        for k in range(S):
            col_sub = L3[:, :, k:k + 1]                               # (TB, S, 1)  L[:, :, k]
            col_lan = lt_flat[:, k * S:(k + 1) * S][:, None, :]       # (TB, 1, S)  L[:, :, k]
            acc = acc + col_sub * col_lan
    else:
        acc = jnp.einsum("bik,bjk->bij", L3, L3,
                         preferred_element_type=jnp.float32)

    c_ref[...] = acc + ALPHA * eye


# --------------------------------------------------------------------------
# Wrapper helpers
# --------------------------------------------------------------------------
def _round_up(a, m):
    return (a + m - 1) // m * m


def _physical_vmem_bytes():
    try:
        return int(pltpu.get_tpu_info().vmem_capacity_bytes)
    except Exception:
        return 64 * 1024 * 1024          # conservative default (v7x per-TensorCore VMEM)


def _vmem_needed_bytes(TB, SX, H, S):
    SS = S * S
    wout = 2 * SS + S
    f32 = 4
    weights = (SX * 2 * H + 2 * H) + (2 * H * 2 * H + 2 * H) + (2 * H * wout + wout) + S * SS
    io = TB * SX + TB * SS + TB * S * S                    # activation + L + C blocks
    tmp = TB * (2 * wout + 3 * SS + 3 * S * S + 4 * H)     # in-kernel temporaries
    return f32 * (2 * weights + 2 * io + TB * S * S + tmp) + (4 << 20)


def _pick_batch_tile(B, SX, H, S, vmem_cap):
    """Largest batch tile (multiple of 8, <=256) dividing the padded batch & fitting VMEM."""
    Bp = _round_up(B, 8)
    cands = [t for t in range(8, min(256, Bp) + 1, 8)
             if Bp % t == 0 and _vmem_needed_bytes(t, SX, H, S) <= vmem_cap]
    if not cands:
        cands = [8]
    TB = cands[-1]
    if Bp // TB == 1 and len(cands) > 1:
        TB = cands[-2]                    # >=2 grid steps so both v7x TensorCores get work
    return TB, Bp, Bp // TB


# --------------------------------------------------------------------------
# Wrapper
# --------------------------------------------------------------------------
def encoder_covariance_forward(x, params):
    """x: (B, S, X) float32.  Returns (L, C), each (B, S, S) float32."""
    B, S, X = x.shape
    (w1, b1, w2, b2, w3, b3, v1, c1, v2, c2, v3, c3) = params
    SX, SS, H = S * X, S * S, w1.shape[1]
    wout = 2 * SS + S

    # ---- fold the two MLPs into one block-diagonal MLP (3 matmuls total) and fold
    #      the strict-lower / strict-upper masks into the last-layer weights.
    idx = np.arange(SS)
    rows_f, cols_f = idx // S, idx % S
    low = jnp.asarray((cols_f < rows_f).astype(np.float32))           # strict lower (flat)
    upp = jnp.asarray((cols_f > rows_f).astype(np.float32))           # strict upper (flat)

    W1f = jnp.concatenate([w1, v1], axis=1)                           # (SX, 2H)
    B1f = jnp.concatenate([b1, c1], axis=1)                           # (1, 2H)
    zH = jnp.zeros((H, H), jnp.float32)
    W2f = jnp.concatenate([jnp.concatenate([w2, zH], axis=1),
                           jnp.concatenate([zH, v2], axis=1)], axis=0)  # (2H, 2H)
    B2f = jnp.concatenate([b2, c2], axis=1)                           # (1, 2H)

    v3m = v3 * low[None, :]                                           # strict-lower(M) cols
    c3m = c3 * low[None, :]
    v3t = v3.reshape(H, S, S).transpose(0, 2, 1).reshape(H, SS) * upp[None, :]
    c3t = c3.reshape(1, S, S).transpose(0, 2, 1).reshape(1, SS) * upp[None, :]
    zSSd = jnp.zeros((H, SS), jnp.float32)
    zSd = jnp.zeros((H, S), jnp.float32)
    W3f = jnp.concatenate([jnp.concatenate([zSSd, zSSd, w3], axis=1),   # rows: diag hidden
                           jnp.concatenate([v3m, v3t, zSd], axis=1)],   # rows: full hidden
                          axis=0)                                     # (2H, 2*SS + S)
    B3f = jnp.concatenate([c3m, c3t, b3], axis=1)                     # (1, 2*SS + S)

    # diag scatter matrix: E[i, i*(S+1)] = 1  ->  exp(d) @ E puts exp(d_i) on the diagonal
    E_np = np.zeros((S, SS), np.float32)
    E_np[np.arange(S), np.arange(S) * (S + 1)] = 1.0
    E = jnp.asarray(E_np)

    # ---- batch tiling / padding / VMEM budget (per-generation cap)
    vmem_cap = int(_physical_vmem_bytes() * 0.85)   # ~54 MiB v7x, ~109 MiB v5e/v6e
    TB, Bp, nb = _pick_batch_tile(B, SX, H, S, vmem_cap)
    vmem_limit = int(min(vmem_cap, max(16 << 20, _vmem_needed_bytes(TB, SX, H, S))))

    xf = x.reshape(B, SX)                                             # == torch x.view(B, -1)
    if Bp != B:
        xf = jnp.concatenate([xf, jnp.zeros((Bp - B, SX), xf.dtype)], axis=0)

    def const_spec(shape):                                            # weights stay resident
        return pl.BlockSpec(shape, lambda b: (0,) * len(shape))

    in_specs = [
        pl.BlockSpec((TB, SX), lambda b: (b, 0)),                     # activations tiled on B
        const_spec((SX, 2 * H)), const_spec((1, 2 * H)),
        const_spec((2 * H, 2 * H)), const_spec((1, 2 * H)),
        const_spec((2 * H, wout)), const_spec((1, wout)),
        const_spec((S, SS)),
    ]
    out_specs = (
        pl.BlockSpec((TB, SS), lambda b: (b, 0)),                     # L, lane-dense flat
        pl.BlockSpec((TB, S, S), lambda b: (b, 0, 0)),                # C
    )

    flops = 2 * Bp * (SX * 2 * H + (2 * H) ** 2 + 2 * H * wout + 2 * S * SS)
    bytes_accessed = 4 * (Bp * SX + SX * 2 * H + (2 * H) ** 2 + 2 * H * wout
                          + S * SS + Bp * SS + Bp * S * S)
    cost = pl.CostEstimate(flops=flops, transcendentals=Bp * S,
                           bytes_accessed=bytes_accessed)

    l_flat, C = pl.pallas_call(
        functools.partial(fused_kernel, seq_len=S),
        out_shape=(jax.ShapeDtypeStruct((Bp, SS), jnp.float32),
                   jax.ShapeDtypeStruct((Bp, S, S), jnp.float32)),
        grid=(nb,),
        in_specs=in_specs,
        out_specs=out_specs,
        scratch_shapes=[pltpu.VMEM((TB, S, S), jnp.float32)],
        compiler_params=pltpu.CompilerParams(
            dimension_semantics=("parallel",),                        # megacore on v7x
            vmem_limit_bytes=vmem_limit),
        cost_estimate=cost,
    )(xf, W1f, B1f, W2f, B2f, W3f, B3f, E)

    L = l_flat[:B].reshape(B, S, S)                                   # free metadata reshape
    C = C[:B]
    return L, C


# --------------------------------------------------------------------------
# Deterministic parameter init (mimics torch.nn.Linear default U(-k, k), k=1/sqrt(fan_in))
# --------------------------------------------------------------------------
def init_params(key, seq_len, x_dim, inter_dim):
    dims_diag = [(seq_len * x_dim, inter_dim), (inter_dim, inter_dim), (inter_dim, seq_len)]
    dims_full = [(seq_len * x_dim, inter_dim), (inter_dim, inter_dim),
                 (inter_dim, seq_len * seq_len)]
    params = []
    for fan_in, fan_out in dims_diag + dims_full:
        key, kw, kb = jax.random.split(key, 3)
        bound = 1.0 / jnp.sqrt(fan_in)
        w = jax.random.uniform(kw, (fan_in, fan_out), jnp.float32, -bound, bound)
        b = jax.random.uniform(kb, (1, fan_out), jnp.float32, -bound, bound)
        params += [w, b]
    return tuple(params)


# --------------------------------------------------------------------------
# Pure-JAX reference (mirrors the PyTorch forward exactly)
# --------------------------------------------------------------------------
def reference_forward(x, params):
    (w1, b1, w2, b2, w3, b3, v1, c1, v2, c2, v3, c3) = params
    B, S, X = x.shape
    xf = x.reshape(B, S * X)

    h = jnp.maximum(xf @ w1 + b1, 0.0)
    h = jnp.maximum(h @ w2 + b2, 0.0)
    D = jnp.exp(h @ w3 + b3)                                          # (B, S)

    g = jnp.maximum(xf @ v1 + c1, 0.0)
    g = jnp.maximum(g @ v2 + c2, 0.0)
    M = (g @ v3 + c3).reshape(B, S, S)

    eye = jnp.eye(S, dtype=jnp.float32)
    M = M * (1.0 - eye)[None]                                         # zero the diagonal
    L = jnp.tril(jnp.einsum("bi,ij->bij", D, eye) + M)
    C = jnp.einsum("bik,bjk->bij", L, L) + ALPHA * eye[None]
    return L, C


if __name__ == "__main__":
    # batch, sequence_length, x_dimension, inter_dim  (B=16 -> padded tile 8, 2 grid steps)
    B, S, X, H = 16, 8, 4, 32

    key = jax.random.PRNGKey(0)
    key, kx = jax.random.split(key)
    x = jax.random.normal(kx, (B, S, X), dtype=jnp.float32)
    params = init_params(key, S, X, H)

    fwd = jax.jit(encoder_covariance_forward)
    L, C = fwd(x, params)
    jax.block_until_ready((L, C))

    L_ref, C_ref = reference_forward(x, params)
    assert L.shape == (B, S, S) and C.shape == (B, S, S)
    assert jnp.allclose(L, L_ref, atol=1e-4, rtol=1e-4), "L mismatch vs reference"
    assert jnp.allclose(C, C_ref, atol=1e-4, rtol=1e-4), "C mismatch vs reference"

    print("KERNEL_OK")
</pallas_src>

<mosaic_0001>
module attributes {stable_mosaic.version = 11 : i64} {
  func.func @fused_kernel(%arg0: i32, %arg1: memref<8x32xf32, #tpu.memory_space<vmem>>, %arg2: memref<32x64xf32, #tpu.memory_space<vmem>>, %arg3: memref<1x64xf32, #tpu.memory_space<vmem>>, %arg4: memref<64x64xf32, #tpu.memory_space<vmem>>, %arg5: memref<1x64xf32, #tpu.memory_space<vmem>>, %arg6: memref<64x136xf32, #tpu.memory_space<vmem>>, %arg7: memref<1x136xf32, #tpu.memory_space<vmem>>, %arg8: memref<8x64xf32, #tpu.memory_space<vmem>>, %arg9: memref<8x64xf32, #tpu.memory_space<vmem>>, %arg10: memref<8x8x8xf32, #tpu.memory_space<vmem>>, %arg11: memref<8x8x8xf32, #tpu.memory_space<vmem>>) attributes {dimension_semantics = [#tpu.dimension_semantics<parallel>], iteration_bounds = array<i64: 2>, scalar_prefetch = 0 : i64, scratch_operands = 1 : i64, tpu.core_type = #tpu.core_type<tc>, window_params = [{transform_indices = @transform_0, window_bounds = array<i64: 8, 32>}, {pipeline_mode = #tpu.pipeline_mode<synchronous>, transform_indices = @transform_1, window_bounds = array<i64: 32, 64>}, {pipeline_mode = #tpu.pipeline_mode<synchronous>, transform_indices = @transform_2, window_bounds = array<i64: 1, 64>}, {pipeline_mode = #tpu.pipeline_mode<synchronous>, transform_indices = @transform_3, window_bounds = array<i64: 64, 64>}, {pipeline_mode = #tpu.pipeline_mode<synchronous>, transform_indices = @transform_4, window_bounds = array<i64: 1, 64>}, {pipeline_mode = #tpu.pipeline_mode<synchronous>, transform_indices = @transform_5, window_bounds = array<i64: 64, 136>}, {pipeline_mode = #tpu.pipeline_mode<synchronous>, transform_indices = @transform_6, window_bounds = array<i64: 1, 136>}, {pipeline_mode = #tpu.pipeline_mode<synchronous>, transform_indices = @transform_7, window_bounds = array<i64: 8, 64>}, {transform_indices = @transform_8, window_bounds = array<i64: 8, 64>}, {transform_indices = @transform_9, window_bounds = array<i64: 8, 8, 8>}]} {
    %c0 = arith.constant 0 : index
    %c0_0 = arith.constant 0 : index
    %0 = vector.load %arg1[%c0, %c0_0] : memref<8x32xf32, #tpu.memory_space<vmem>>, vector<8x32xf32>
    %c0_1 = arith.constant 0 : index
    %c0_2 = arith.constant 0 : index
    %1 = vector.load %arg2[%c0_1, %c0_2] : memref<32x64xf32, #tpu.memory_space<vmem>>, vector<32x64xf32>
    %cst = arith.constant dense<0.000000e+00> : vector<8x64xf32>
    %2 = tpu.matmul %0, %1, %cst {dimension_numbers = #tpu.dot_dimension_numbers<[1], [0], [0], [1], [0, 0, 1, 1], [], []>} : vector<8x32xf32>, vector<32x64xf32>, vector<8x64xf32> -> vector<8x64xf32>
    %c0_3 = arith.constant 0 : index
    %c0_4 = arith.constant 0 : index
    %3 = vector.load %arg3[%c0_3, %c0_4] : memref<1x64xf32, #tpu.memory_space<vmem>>, vector<1x64xf32>
    %4 = vector.broadcast %3 : vector<1x64xf32> to vector<8x64xf32>
    %5 = arith.addf %2, %4 : vector<8x64xf32>
    %cst_5 = arith.constant 0.000000e+00 : f32
    %6 = vector.broadcast %cst_5 : f32 to vector<8x64xf32>
    %7 = arith.maximumf %5, %6 : vector<8x64xf32>
    %c0_6 = arith.constant 0 : index
    %c0_7 = arith.constant 0 : index
    %8 = vector.load %arg4[%c0_6, %c0_7] : memref<64x64xf32, #tpu.memory_space<vmem>>, vector<64x64xf32>
    %cst_8 = arith.constant dense<0.000000e+00> : vector<8x64xf32>
    %9 = tpu.matmul %7, %8, %cst_8 {dimension_numbers = #tpu.dot_dimension_numbers<[1], [0], [0], [1], [0, 0, 1, 1], [], []>} : vector<8x64xf32>, vector<64x64xf32>, vector<8x64xf32> -> vector<8x64xf32>
    %c0_9 = arith.constant 0 : index
    %c0_10 = arith.constant 0 : index
    %10 = vector.load %arg5[%c0_9, %c0_10] : memref<1x64xf32, #tpu.memory_space<vmem>>, vector<1x64xf32>
    %11 = vector.broadcast %10 : vector<1x64xf32> to vector<8x64xf32>
    %12 = arith.addf %9, %11 : vector<8x64xf32>
    %cst_11 = arith.constant 0.000000e+00 : f32
    %13 = vector.broadcast %cst_11 : f32 to vector<8x64xf32>
    %14 = arith.maximumf %12, %13 : vector<8x64xf32>
    %c0_12 = arith.constant 0 : index
    %c0_13 = arith.constant 0 : index
    %15 = vector.load %arg6[%c0_12, %c0_13] : memref<64x136xf32, #tpu.memory_space<vmem>>, vector<64x136xf32>
    %cst_14 = arith.constant dense<0.000000e+00> : vector<8x136xf32>
    %16 = tpu.matmul %14, %15, %cst_14 {dimension_numbers = #tpu.dot_dimension_numbers<[1], [0], [0], [1], [0, 0, 1, 1], [], []>} : vector<8x64xf32>, vector<64x136xf32>, vector<8x136xf32> -> vector<8x136xf32>
    %c0_15 = arith.constant 0 : index
    %c0_16 = arith.constant 0 : index
    %17 = vector.load %arg7[%c0_15, %c0_16] : memref<1x136xf32, #tpu.memory_space<vmem>>, vector<1x136xf32>
    %18 = vector.broadcast %17 : vector<1x136xf32> to vector<8x136xf32>
    %19 = arith.addf %16, %18 : vector<8x136xf32>
    %20 = vector.extract_strided_slice %19 {offsets = [0, 128], sizes = [8, 8], strides = [1, 1]} : vector<8x136xf32> to vector<8x8xf32>
    %21 = math.exp %20 : vector<8x8xf32>
    %c0_17 = arith.constant 0 : index
    %c0_18 = arith.constant 0 : index
    %22 = vector.load %arg8[%c0_17, %c0_18] : memref<8x64xf32, #tpu.memory_space<vmem>>, vector<8x64xf32>
    %cst_19 = arith.constant dense<0.000000e+00> : vector<8x64xf32>
    %23 = tpu.matmul %21, %22, %cst_19 {dimension_numbers = #tpu.dot_dimension_numbers<[1], [0], [0], [1], [0, 0, 1, 1], [], []>} : vector<8x8xf32>, vector<8x64xf32>, vector<8x64xf32> -> vector<8x64xf32>
    %24 = vector.extract_strided_slice %19 {offsets = [0, 0], sizes = [8, 64], strides = [1, 1]} : vector<8x136xf32> to vector<8x64xf32>
    %25 = arith.addf %24, %23 : vector<8x64xf32>
    %26 = vector.extract_strided_slice %19 {offsets = [0, 64], sizes = [8, 64], strides = [1, 1]} : vector<8x136xf32> to vector<8x64xf32>
    %27 = arith.addf %26, %23 : vector<8x64xf32>
    %c0_20 = arith.constant 0 : index
    %c0_21 = arith.constant 0 : index
    %28 = vector.load %arg9[%c0_20, %c0_21] : memref<8x64xf32, #tpu.memory_space<vmem>>, vector<8x64xf32>
    tpu.vector_store %arg9[%c0_20, %c0_21], %25 {strides = array<i32>} : memref<8x64xf32, #tpu.memory_space<vmem>>, vector<8x64xf32>,
    %29 = vector.extract_strided_slice %25 {offsets = [0, 0], sizes = [8, 8], strides = [1, 1]} : vector<8x64xf32> to vector<8x8xf32>
    %30 = vector.shape_cast %29 : vector<8x8xf32> to vector<8x1x8xf32>
    %c0_22 = arith.constant 0 : index
    %c0_23 = arith.constant 0 : index
    %c0_24 = arith.constant 0 : index
    %31 = vector.load %arg11[%c0_22, %c0_23, %c0_24] : memref<8x8x8xf32, #tpu.memory_space<vmem>>, vector<8x1x8xf32>
    tpu.vector_store %arg11[%c0_22, %c0_23, %c0_24], %30 {strides = array<i32>} : memref<8x8x8xf32, #tpu.memory_space<vmem>>, vector<8x1x8xf32>,
    %32 = vector.extract_strided_slice %25 {offsets = [0, 8], sizes = [8, 8], strides = [1, 1]} : vector<8x64xf32> to vector<8x8xf32>
    %33 = vector.shape_cast %32 : vector<8x8xf32> to vector<8x1x8xf32>
    %c0_25 = arith.constant 0 : index
    %c1 = arith.constant 1 : index
    %c0_26 = arith.constant 0 : index
    %34 = vector.load %arg11[%c0_25, %c1, %c0_26] : memref<8x8x8xf32, #tpu.memory_space<vmem>>, vector<8x1x8xf32>
    tpu.vector_store %arg11[%c0_25, %c1, %c0_26], %33 {strides = array<i32>} : memref<8x8x8xf32, #tpu.memory_space<vmem>>, vector<8x1x8xf32>,
    %35 = vector.extract_strided_slice %25 {offsets = [0, 16], sizes = [8, 8], strides = [1, 1]} : vector<8x64xf32> to vector<8x8xf32>
    %36 = vector.shape_cast %35 : vector<8x8xf32> to vector<8x1x8xf32>
    %c0_27 = arith.constant 0 : index
    %c2 = arith.constant 2 : index
    %c0_28 = arith.constant 0 : index
    %37 = vector.load %arg11[%c0_27, %c2, %c0_28] : memref<8x8x8xf32, #tpu.memory_space<vmem>>, vector<8x1x8xf32>
    tpu.vector_store %arg11[%c0_27, %c2, %c0_28], %36 {strides = array<i32>} : memref<8x8x8xf32, #tpu.memory_space<vmem>>, vector<8x1x8xf32>,
    %38 = vector.extract_strided_slice %25 {offsets = [0, 24], sizes = [8, 8], strides = [1, 1]} : vector<8x64xf32> to vector<8x8xf32>
    %39 = vector.shape_cast %38 : vector<8x8xf32> to vector<8x1x8xf32>
    %c0_29 = arith.constant 0 : index
    %c3 = arith.constant 3 : index
    %c0_30 = arith.constant 0 : index
    %40 = vector.load %arg11[%c0_29, %c3, %c0_30] : memref<8x8x8xf32, #tpu.memory_space<vmem>>, vector<8x1x8xf32>
    tpu.vector_store %arg11[%c0_29, %c3, %c0_30], %39 {strides = array<i32>} : memref<8x8x8xf32, #tpu.memory_space<vmem>>, vector<8x1x8xf32>,
    %41 = vector.extract_strided_slice %25 {offsets = [0, 32], sizes = [8, 8], strides = [1, 1]} : vector<8x64xf32> to vector<8x8xf32>
    %42 = vector.shape_cast %41 : vector<8x8xf32> to vector<8x1x8xf32>
    %c0_31 = arith.constant 0 : index
    %c4 = arith.constant 4 : index
    %c0_32 = arith.constant 0 : index
    %43 = vector.load %arg11[%c0_31, %c4, %c0_32] : memref<8x8x8xf32, #tpu.memory_space<vmem>>, vector<8x1x8xf32>
    tpu.vector_store %arg11[%c0_31, %c4, %c0_32], %42 {strides = array<i32>} : memref<8x8x8xf32, #tpu.memory_space<vmem>>, vector<8x1x8xf32>,
    %44 = vector.extract_strided_slice %25 {offsets = [0, 40], sizes = [8, 8], strides = [1, 1]} : vector<8x64xf32> to vector<8x8xf32>
    %45 = vector.shape_cast %44 : vector<8x8xf32> to vector<8x1x8xf32>
    %c0_33 = arith.constant 0 : index
    %c5 = arith.constant 5 : index
    %c0_34 = arith.constant 0 : index
    %46 = vector.load %arg11[%c0_33, %c5, %c0_34] : memref<8x8x8xf32, #tpu.memory_space<vmem>>, vector<8x1x8xf32>
    tpu.vector_store %arg11[%c0_33, %c5, %c0_34], %45 {strides = array<i32>} : memref<8x8x8xf32, #tpu.memory_space<vmem>>, vector<8x1x8xf32>,
    %47 = vector.extract_strided_slice %25 {offsets = [0, 48], sizes = [8, 8], strides = [1, 1]} : vector<8x64xf32> to vector<8x8xf32>
    %48 = vector.shape_cast %47 : vector<8x8xf32> to vector<8x1x8xf32>
    %c0_35 = arith.constant 0 : index
    %c6 = arith.constant 6 : index
    %c0_36 = arith.constant 0 : index
    %49 = vector.load %arg11[%c0_35, %c6, %c0_36] : memref<8x8x8xf32, #tpu.memory_space<vmem>>, vector<8x1x8xf32>
    tpu.vector_store %arg11[%c0_35, %c6, %c0_36], %48 {strides = array<i32>} : memref<8x8x8xf32, #tpu.memory_space<vmem>>, vector<8x1x8xf32>,
    %50 = vector.extract_strided_slice %25 {offsets = [0, 56], sizes = [8, 8], strides = [1, 1]} : vector<8x64xf32> to vector<8x8xf32>
    %51 = vector.shape_cast %50 : vector<8x8xf32> to vector<8x1x8xf32>
    %c0_37 = arith.constant 0 : index
    %c7 = arith.constant 7 : index
    %c0_38 = arith.constant 0 : index
    %52 = vector.load %arg11[%c0_37, %c7, %c0_38] : memref<8x8x8xf32, #tpu.memory_space<vmem>>, vector<8x1x8xf32>
    tpu.vector_store %arg11[%c0_37, %c7, %c0_38], %51 {strides = array<i32>} : memref<8x8x8xf32, #tpu.memory_space<vmem>>, vector<8x1x8xf32>,
    %c0_39 = arith.constant 0 : index
    %c0_40 = arith.constant 0 : index
    %c0_41 = arith.constant 0 : index
    %53 = vector.load %arg11[%c0_39, %c0_40, %c0_41] : memref<8x8x8xf32, #tpu.memory_space<vmem>>, vector<8x8x8xf32>
    %54 = tpu.iota {dimensions = array<i32: 0>} : vector<8x8xi32>
    %55 = tpu.iota {dimensions = array<i32: 1>} : vector<8x8xi32>
    %56 = arith.cmpi eq, %54, %55 : vector<8x8xi32>
    %57 = arith.extui %56 : vector<8x8xi1> to vector<8x8xi32>
    %58 = arith.sitofp %57 : vector<8x8xi32> to vector<8x8xf32>
    %59 = vector.shape_cast %58 : vector<8x8xf32> to vector<1x8x8xf32>
    %cst_42 = arith.constant 0.000000e+00 : f32
    %60 = vector.broadcast %cst_42 : f32 to vector<8x8x8xf32>
    %61 = vector.extract_strided_slice %53 {offsets = [0, 0, 0], sizes = [8, 8, 1], strides = [1, 1, 1]} : vector<8x8x8xf32> to vector<8x8x1xf32>
    %62 = vector.extract_strided_slice %27 {offsets = [0, 0], sizes = [8, 8], strides = [1, 1]} : vector<8x64xf32> to vector<8x8xf32>
    %63 = vector.shape_cast %62 : vector<8x8xf32> to vector<8x1x8xf32>
    %64 = vector.broadcast %61 : vector<8x8x1xf32> to vector<8x8x8xf32>
    %65 = vector.broadcast %63 : vector<8x1x8xf32> to vector<8x8x8xf32>
    %66 = arith.mulf %64, %65 : vector<8x8x8xf32>
    %67 = arith.addf %60, %66 : vector<8x8x8xf32>
    %68 = vector.extract_strided_slice %53 {offsets = [0, 0, 1], sizes = [8, 8, 1], strides = [1, 1, 1]} : vector<8x8x8xf32> to vector<8x8x1xf32>
    %69 = vector.extract_strided_slice %27 {offsets = [0, 8], sizes = [8, 8], strides = [1, 1]} : vector<8x64xf32> to vector<8x8xf32>
    %70 = vector.shape_cast %69 : vector<8x8xf32> to vector<8x1x8xf32>
    %71 = vector.broadcast %68 : vector<8x8x1xf32> to vector<8x8x8xf32>
    %72 = vector.broadcast %70 : vector<8x1x8xf32> to vector<8x8x8xf32>
    %73 = arith.mulf %71, %72 : vector<8x8x8xf32>
    %74 = arith.addf %67, %73 : vector<8x8x8xf32>
    %75 = vector.extract_strided_slice %53 {offsets = [0, 0, 2], sizes = [8, 8, 1], strides = [1, 1, 1]} : vector<8x8x8xf32> to vector<8x8x1xf32>
    %76 = vector.extract_strided_slice %27 {offsets = [0, 16], sizes = [8, 8], strides = [1, 1]} : vector<8x64xf32> to vector<8x8xf32>
    %77 = vector.shape_cast %76 : vector<8x8xf32> to vector<8x1x8xf32>
    %78 = vector.broadcast %75 : vector<8x8x1xf32> to vector<8x8x8xf32>
    %79 = vector.broadcast %77 : vector<8x1x8xf32> to vector<8x8x8xf32>
    %80 = arith.mulf %78, %79 : vector<8x8x8xf32>
    %81 = arith.addf %74, %80 : vector<8x8x8xf32>
    %82 = vector.extract_strided_slice %53 {offsets = [0, 0, 3], sizes = [8, 8, 1], strides = [1, 1, 1]} : vector<8x8x8xf32> to vector<8x8x1xf32>
    %83 = vector.extract_strided_slice %27 {offsets = [0, 24], sizes = [8, 8], strides = [1, 1]} : vector<8x64xf32> to vector<8x8xf32>
    %84 = vector.shape_cast %83 : vector<8x8xf32> to vector<8x1x8xf32>
    %85 = vector.broadcast %82 : vector<8x8x1xf32> to vector<8x8x8xf32>
    %86 = vector.broadcast %84 : vector<8x1x8xf32> to vector<8x8x8xf32>
    %87 = arith.mulf %85, %86 : vector<8x8x8xf32>
    %88 = arith.addf %81, %87 : vector<8x8x8xf32>
    %89 = vector.extract_strided_slice %53 {offsets = [0, 0, 4], sizes = [8, 8, 1], strides = [1, 1, 1]} : vector<8x8x8xf32> to vector<8x8x1xf32>
    %90 = vector.extract_strided_slice %27 {offsets = [0, 32], sizes = [8, 8], strides = [1, 1]} : vector<8x64xf32> to vector<8x8xf32>
    %91 = vector.shape_cast %90 : vector<8x8xf32> to vector<8x1x8xf32>
    %92 = vector.broadcast %89 : vector<8x8x1xf32> to vector<8x8x8xf32>
    %93 = vector.broadcast %91 : vector<8x1x8xf32> to vector<8x8x8xf32>
    %94 = arith.mulf %92, %93 : vector<8x8x8xf32>
    %95 = arith.addf %88, %94 : vector<8x8x8xf32>
    %96 = vector.extract_strided_slice %53 {offsets = [0, 0, 5], sizes = [8, 8, 1], strides = [1, 1, 1]} : vector<8x8x8xf32> to vector<8x8x1xf32>
    %97 = vector.extract_strided_slice %27 {offsets = [0, 40], sizes = [8, 8], strides = [1, 1]} : vector<8x64xf32> to vector<8x8xf32>
    %98 = vector.shape_cast %97 : vector<8x8xf32> to vector<8x1x8xf32>
    %99 = vector.broadcast %96 : vector<8x8x1xf32> to vector<8x8x8xf32>
    %100 = vector.broadcast %98 : vector<8x1x8xf32> to vector<8x8x8xf32>
    %101 = arith.mulf %99, %100 : vector<8x8x8xf32>
    %102 = arith.addf %95, %101 : vector<8x8x8xf32>
    %103 = vector.extract_strided_slice %53 {offsets = [0, 0, 6], sizes = [8, 8, 1], strides = [1, 1, 1]} : vector<8x8x8xf32> to vector<8x8x1xf32>
    %104 = vector.extract_strided_slice %27 {offsets = [0, 48], sizes = [8, 8], strides = [1, 1]} : vector<8x64xf32> to vector<8x8xf32>
    %105 = vector.shape_cast %104 : vector<8x8xf32> to vector<8x1x8xf32>
    %106 = vector.broadcast %103 : vector<8x8x1xf32> to vector<8x8x8xf32>
    %107 = vector.broadcast %105 : vector<8x1x8xf32> to vector<8x8x8xf32>
    %108 = arith.mulf %106, %107 : vector<8x8x8xf32>
    %109 = arith.addf %102, %108 : vector<8x8x8xf32>
    %110 = vector.extract_strided_slice %53 {offsets = [0, 0, 7], sizes = [8, 8, 1], strides = [1, 1, 1]} : vector<8x8x8xf32> to vector<8x8x1xf32>
    %111 = vector.extract_strided_slice %27 {offsets = [0, 56], sizes = [8, 8], strides = [1, 1]} : vector<8x64xf32> to vector<8x8xf32>
    %112 = vector.shape_cast %111 : vector<8x8xf32> to vector<8x1x8xf32>
    %113 = vector.broadcast %110 : vector<8x8x1xf32> to vector<8x8x8xf32>
    %114 = vector.broadcast %112 : vector<8x1x8xf32> to vector<8x8x8xf32>
    %115 = arith.mulf %113, %114 : vector<8x8x8xf32>
    %116 = arith.addf %109, %115 : vector<8x8x8xf32>
    %cst_43 = arith.constant 9.99999997E-7 : f32
    %117 = vector.broadcast %cst_43 : f32 to vector<1x8x8xf32>
    %118 = arith.mulf %117, %59 : vector<1x8x8xf32>
    %119 = vector.broadcast %118 : vector<1x8x8xf32> to vector<8x8x8xf32>
    %120 = arith.addf %116, %119 : vector<8x8x8xf32>
    %c0_44 = arith.constant 0 : index
    %c0_45 = arith.constant 0 : index
    %c0_46 = arith.constant 0 : index
    %121 = vector.load %arg10[%c0_44, %c0_45, %c0_46] : memref<8x8x8xf32, #tpu.memory_space<vmem>>, vector<8x8x8xf32>
    tpu.vector_store %arg10[%c0_44, %c0_45, %c0_46], %120 {strides = array<i32>} : memref<8x8x8xf32, #tpu.memory_space<vmem>>, vector<8x8x8xf32>,
    return
  }
  func.func @transform_0(%arg0: i32) -> (i32, i32) {
    %c0_i32 = arith.constant 0 : i32
    %c0_i32_0 = arith.constant 0 : i32
    return %arg0, %c0_i32 : i32, i32
  }
  func.func @transform_1(%arg0: i32) -> (i32, i32) {
    %c0_i32 = arith.constant 0 : i32
    %c0_i32_0 = arith.constant 0 : i32
    %c0_i32_1 = arith.constant 0 : i32
    return %c0_i32, %c0_i32_0 : i32, i32
  }
  func.func @transform_2(%arg0: i32) -> (i32, i32) {
    %c0_i32 = arith.constant 0 : i32
    %c0_i32_0 = arith.constant 0 : i32
    %c0_i32_1 = arith.constant 0 : i32
    return %c0_i32, %c0_i32_0 : i32, i32
  }
  func.func @transform_3(%arg0: i32) -> (i32, i32) {
    %c0_i32 = arith.constant 0 : i32
    %c0_i32_0 = arith.constant 0 : i32
    %c0_i32_1 = arith.constant 0 : i32
    return %c0_i32, %c0_i32_0 : i32, i32
  }
  func.func @transform_4(%arg0: i32) -> (i32, i32) {
    %c0_i32 = arith.constant 0 : i32
    %c0_i32_0 = arith.constant 0 : i32
    %c0_i32_1 = arith.constant 0 : i32
    return %c0_i32, %c0_i32_0 : i32, i32
  }
  func.func @transform_5(%arg0: i32) -> (i32, i32) {
    %c0_i32 = arith.constant 0 : i32
    %c0_i32_0 = arith.constant 0 : i32
    %c0_i32_1 = arith.constant 0 : i32
    return %c0_i32, %c0_i32_0 : i32, i32
  }
  func.func @transform_6(%arg0: i32) -> (i32, i32) {
    %c0_i32 = arith.constant 0 : i32
    %c0_i32_0 = arith.constant 0 : i32
    %c0_i32_1 = arith.constant 0 : i32
    return %c0_i32, %c0_i32_0 : i32, i32
  }
  func.func @transform_7(%arg0: i32) -> (i32, i32) {
    %c0_i32 = arith.constant 0 : i32
    %c0_i32_0 = arith.constant 0 : i32
    %c0_i32_1 = arith.constant 0 : i32
    return %c0_i32, %c0_i32_0 : i32, i32
  }
  func.func @transform_8(%arg0: i32) -> (i32, i32) {
    %c0_i32 = arith.constant 0 : i32
    %c0_i32_0 = arith.constant 0 : i32
    return %arg0, %c0_i32 : i32, i32
  }
  func.func @transform_9(%arg0: i32) -> (i32, i32, i32) {
    %c0_i32 = arith.constant 0 : i32
    %c0_i32_0 = arith.constant 0 : i32
    %c0_i32_1 = arith.constant 0 : i32
    return %arg0, %c0_i32, %c0_i32_0 : i32, i32, i32
  }
}

</mosaic_0001>

<bundles_post_ra>
// kernel: encoder_covariance_forward.1
= control target key start
LH: loop header
LB: loop body
LE: loop exit
PB: predicated region body
PF: predicated region fallthrough
CT: control target
= control target key end

     0   :  { %s2144_s30 = smov 0   ;;  %s2735_s0 = inlined_call_operand.vmem [shape: f32[16,32], index: 0, kind: input, shape index: {}]   ;;  %s2736_s1 = inlined_call_operand.vmem [shape: f32[32,64], index: 1, kind: input, shape index: {}]   ;;  %s2737_s2 = inlined_call_operand.vmem [shape: f32[1,64], index: 2, kind: input, shape index: {}]   ;;  %s2738_s3 = inlined_call_operand.vmem [shape: f32[64,64], index: 3, kind: input, shape index: {}]   ;;  %s2739_s4 = inlined_call_operand.vmem [shape: f32[1,64], index: 4, kind: input, shape index: {}]   ;;  %s2740_s5 = inlined_call_operand.vmem [shape: f32[64,136], index: 5, kind: input, shape index: {}]   ;;  %s2741_s6 = inlined_call_operand.vmem [shape: f32[1,136], index: 6, kind: input, shape index: {}]   ;;  %s2742_s7 = inlined_call_operand.vmem [shape: f32[8,64], index: 7, kind: input, shape index: {}]   ;;  %s2743_s8 = inlined_call_operand.vmem [shape: f32[16,64], index: 8, kind: output, shape index: {0}]   ;;  %s2744_s9 = inlined_call_operand.vmem [shape: f32[16,8,8], index: 9, kind: output, shape index: {1}]  }
   0x1 LB: > { %s2150_s10 = sadd.s32 4294967295, %s2072_s30   ;;  %p1893_p0 = scmp.ge.s32.totalorder %s2072_s30, 1  ;;  %s2072_s30 = sphi %s2144_s30, %s20_s30  }
   0x2   : > { %p289_p1 = scmp.lt.s32.totalorder %s2072_s30, 3 }
   0x4   : > { %p290_p2 = pnand %p1893_p0, %p289_p1 }
   0x5   : > { %v343_v0 = vld [vmem:[%s2736_s1] sm:$0xff] (!%p290_p2)  ;;  %v344_v1 = vld [vmem:[%s2736_s1 + $0x8] sm:$0xff] (!%p290_p2)  ;;  %v345_v2 = vld [vmem:[%s2736_s1 + $0x10] sm:$0xff] (!%p290_p2)  ;;  %v2074_v3 = vmov (!%p290_p2), 0.0|0.0   ;;  %vm2075_vm0 = vmmov (!%p290_p2), 0   ;;  %v2076_v6 = vmov (!%p290_p2), 0.0   ;;  %v537_v56 = vlaneseq (!%p290_p2) }
   0x6   : > { %293 = sbr.rel (%p290_p2) target bundleno = 1618 (0x652), region = 52  ;;  %1958 = vmatprep.subr.bf16.mxu0 (!%p290_p2), %v2074_v3  ;;  %v1959_v4 = vpack.c.bf16 (!%p290_p2), %v344_v1, %v343_v0  ;;  %v346_v5 = vld [vmem:[%s2736_s1 + $0x18] sm:$0xff] (!%p290_p2)  ;;  %1931 = vmatprep.mubr.msk.f32.mxu0 (!%p290_p2), %vm2075_vm0, %v2076_v6  ;;  %p328_p3 = scmp.lt.s32.totalorder (!%p290_p2), %s2150_s10, 1  ;;  %v429_v7 = vld [vmem:[%s2738_s3] sm:$0xff] (!%p290_p2)  ;;  %v430_v8 = vld [vmem:[%s2738_s3 + $0x8] sm:$0xff] (!%p290_p2)  ;;  %vm354_vm1 = vcmask (!%p290_p2), 261120  }
   0x7   : > { %1964 = vmatprep.subr.bf16.mxu1 (!%p290_p2), %v2074_v3  ;;  %v1965_v9 = vpack.c.bf16 (!%p290_p2), %v430_v8, %v429_v7  ;;  %v431_v10 = vld [vmem:[%s2738_s3 + $0x10] sm:$0xff] (!%p290_p2)  ;;  %v432_v11 = vld [vmem:[%s2738_s3 + $0x18] sm:$0xff] (!%p290_p2)  ;;  %1950 = vmatprep.mubr.msk.f32.mxu1 (!%p290_p2), %vm2075_vm0, %v2076_v6  ;;  %v1962_v12 = vpack.c.bf16 (!%p290_p2), %v346_v5, %v345_v2  ;;  %v433_v14 = vld [vmem:[%s2738_s3 + $0x20] sm:$0xff] (!%p290_p2)  ;;  %vm444_vm2 = vcmask (!%p290_p2), 523264   ;;  %v2268_v57 = vshrl.u32 (!%p290_p2), %v537_v56, 7  ;;  %s2078_s13 = smov (!%p290_p2), 64  }
   0x8   : > { %1960 = vmatpush3.bf16.msra.mxu0 (!%p290_p2), %v1959_v4  ;;  %v1968_v13 = vpack.c.bf16 (!%p290_p2), %v432_v11, %v431_v10  ;;  %v434_v15 = vld [vmem:[%s2738_s3 + $0x28] sm:$0xff] (!%p290_p2)  ;;  %v435_v18 = vld [vmem:[%s2738_s3 + $0x30] sm:$0xff] (!%p290_p2)  ;;  %v436_v19 = vld [vmem:[%s2738_s3 + $0x38] sm:$0xff] (!%p290_p2)  ;;  %vm624_vm3 = vcmask (!%p290_p2), 64512   ;;  %vm763_vm4 = vcmask (!%p290_p2), 57344   ;;  %s2081_s14 = smov (!%p290_p2), 104  }
   0x9   : > { %1961 = vmatprep.subr.bf16.mxu0 (!%p290_p2), %v2074_v3  ;;  %1966 = vmatpush3.bf16.msra.mxu1 (!%p290_p2), %v1965_v9  ;;  %v1971_v17 = vpack.c.bf16 (!%p290_p2), %v434_v15, %v433_v14  ;;  %v1974_v20 = vpack.c.bf16 (!%p290_p2), %v436_v19, %v435_v18  ;;  %v520_v21 = vld [vmem:[%s2740_s5 + $0x8] sm:$0xff] (!%p290_p2)  ;;  %v522_v22 = vld [vmem:[%s2740_s5 + $0x18] sm:$0xff] (!%p290_p2)  ;;  %v519_v23 = vld [vmem:[%s2740_s5] sm:$0xff] (!%p290_p2)  ;;  %v543_v58 = vsub.s32 (!%p290_p2), 1, %v2268_v57  ;;  %v2276_v2 = vsub.s32 (!%p290_p2), 0, %v2268_v57  ;;  %s2082_s15 = smov (!%p290_p2), 96  }
   0xa   : > { %1967 = vmatprep.subr.bf16.mxu1 (!%p290_p2), %v2074_v3  ;;  %v1976_v24 = vpack.c.bf16 (!%p290_p2), %v522_v22, %v520_v21  ;;  %v521_v25 = vld [vmem:[%s2740_s5 + $0x10] sm:$0xff] (!%p290_p2)  ;;  %v524_v26 = vld [vmem:[%s2740_s5 + $0x28] sm:$0xff] (!%p290_p2)  ;;  %v526_v27 = vld [vmem:[%s2740_s5 + $0x38] sm:$0xff] (!%p290_p2)  ;;  %s2086_s17 = smov (!%p290_p2), 80   ;;  %s2087_s18 = smov (!%p290_p2), 72  }
   0xb   : > { %v1978_v28 = vpack.c.bf16 (!%p290_p2), %v521_v25, %v519_v23  ;;  %v1980_v29 = vpack.c.bf16 (!%p290_p2), %v526_v27, %v524_v26  ;;  %v523_v30 = vld [vmem:[%s2740_s5 + $0x20] sm:$0xff] (!%p290_p2)  ;;  %v525_v31 = vld [vmem:[%s2740_s5 + $0x30] sm:$0xff] (!%p290_p2)  ;;  %v528_v32 = vld [vmem:[%s2740_s5 + $0x48] sm:$0xff] (!%p290_p2)  ;;  %s1896_s19 = sshll.u32 (!%p290_p2), %s2150_s10, 3 }
   0xc   : > { %1963 = vmatpush3.bf16.msra.mxu0 (!%p290_p2), %v1962_v12  ;;  %v530_v33 = vld [vmem:[%s2740_s5 + $0x58] sm:$0xff] (!%p290_p2)  ;;  %v1982_v34 = vpack.c.bf16 (!%p290_p2), %v525_v31, %v523_v30  ;;  %v527_v36 = vld [vmem:[%s2740_s5 + $0x40] sm:$0xff] (!%p290_p2)  ;;  %v529_v37 = vld [vmem:[%s2740_s5 + $0x50] sm:$0xff] (!%p290_p2)  ;;  %p337_p4 = scmp.lt.s32.totalorder (!%p290_p2), %s1896_s19, 15 }
   0xd   : > { %s2184_s27 = scalar_select %p328_p3, %s2150_s10, 1  ;;  %1969 = vmatpush3.bf16.msra.mxu1 %v1968_v13  ;;  %1977 = vmatprep.subr.bf16.mxu0 %v1976_v24  ;;  %v1984_v35 = vpack.c.bf16 %v530_v33, %v528_v32  ;;  %v1986_v38 = vpack.c.bf16 %v529_v37, %v527_v36  ;;  %v1898_v39 = vld [vmem:[%s2737_s2] ss:$0 sm:$0xff]  ;;  %v532_v44 = vld [vmem:[%s2740_s5 + $0x68] sm:$0xff]  ;;  %v534_v45 = vld [vmem:[%s2740_s5 + $0x78] sm:$0xff] }
   0xe   : > { %1970 = vmatprep.subr.bf16.mxu1 %v2074_v3  ;;  %v1988_v46 = vpack.c.bf16 %v534_v45, %v532_v44  ;;  %v531_v47 = vld [vmem:[%s2740_s5 + $0x60] sm:$0xff]  ;;  %v533_v48 = vld [vmem:[%s2740_s5 + $0x70] sm:$0xff]  ;;  %s2746_s19 = smov (!%p337_p4, %s1896_s19), 15 }
   0xf   : > { %s1894_s28 = sshll.u32 %s2184_s27, 3  ;;  %v1990_v49 = vpack.c.bf16 %v533_v48, %v531_v47  ;;  %v1900_v50 = vld [vmem:[%s2739_s4] ss:$0 sm:$0xff]  ;;  %s2079_s27 = smov 112  }
  0x10   : > { %s331_s16 = scalar_lea.vmem %s2735_s0, %s1894_s28  ;;  %v623_v55 = vld [vmem:[%s2742_s7] sm:$0xff]  ;;  %s335_s12 = scalar_lea.vmem %s2743_s8, %s1894_s28 }
  0x11   : > { %v342_v16 = vld [vmem:[%s331_s16] sm:$0xff]  ;;  %1972 = vmatpush3.bf16.msra.mxu1 %v1971_v17  ;;  %s2080_s28 = smov 120   ;;  %s2083_s16 = smov 88  }
  0x12   : > { %1932 = vmatmul.mubr.msk.f32.vlgmr.msra.gmra.mrb[0].mxu0 %vm354_vm1, %v342_v16  ;;  %1973 = vmatprep.subr.bf16.mxu1 %v2074_v3  ;;  %v535_v59 = vld [vmem:[%s2741_s6] sm:$0x3]  ;;  %v2077_v3 = vmov 1966171168   ;;  %s1897_s20 = sshll.u32 %s2746_s19, 3 }
  0x13   : > { %614 = vmatprep.mubr.f32.mxu0 %v2076_v6  ;;  %1979 = vmatpush1.bf16.msra.mxu0 %v1978_v28  ;;  %v544_v60 = vrot.slane %v535_v59, %v543_v58  ;;  %v708_v4 = vunpack.c.l.s4 %v2077_v3  ;;  %v540_v5 = vrot.slane %v535_v59, %v2276_v2  ;;  %v2084_v28 = vmov 1   ;;  %s340_s23 = scalar_lea.vmem %s2744_s9, %s1897_s20 }
  0x14   : > { %1981 = vmatprep.subr.bf16.mxu0 %v1980_v29  ;;  %2021 = vset.pattern.permute.xlu0 %v2084_v28  ;;  %v2085_v29 = vmov 0   ;;  %v2088_v58 = vmov 2   ;;  %v2089_v59 = vmov 3   ;;  %v2092_v3 = vmov 6  }
  0x15   : > { %1975 = vmatpush3.bf16.msra.mxu1 %v1974_v20  ;;  %v709_v7 = vunpack.c.0.s8 %v708_v4  ;;  %2020 = vset.pattern.permute.xlu1 %v2085_v29  ;;  %v2093_v4 = vmov 7  }
  0x16   : > { %1953 = vmatprep.subr.mxu1 %v2076_v6 }
  0x17   : > { %1983 = vmatpush1.bf16.msra.mxu0 %v1982_v34  ;;  %v2282_v9 = vsub.s32 %v709_v7, %v2268_v57 }
  0x18   : > { %1985 = vmatprep.subr.bf16.mxu0 %v1984_v35 }
  0x1b   : > { %1987 = vmatpush1.bf16.msra.mxu0 %v1986_v38 }
  0x1c   : > { %1989 = vmatprep.subr.bf16.mxu0 %v1988_v46 }
  0x1f   : > { %1991 = vmatpush1.bf16.msra.mxu0 %v1990_v49 }
  0xe5   : > { %v424_v40 = vpop.f32.mrb[0].mxu0 }
  0xe6   : > { %v425_v41 = vadd.f32 %v1898_v39, %v424_v40  ;;  %v1933_v42 = vpop.f32.mrb[1].mxu0 }
  0xe8   : > { %v428_v43 = vmax.f32 %v425_v41, 0.0 }
  0xea   : > { %1951 = vmatmul.mubr.msk.f32.vlgmr.msra.gmra.mrb[0].mxu1 %vm444_vm2, %v428_v43 }
  0xeb   : > { %1955 = vmatprep.mubr.msk.f32.mxu1 %vm2075_vm0, %v2076_v6  ;;  %1954 = vmatpush3.msra.mxu1 %v623_v55 }
 0x1bd   : > { %v514_v51 = vpop.f32.mrb[0].mxu1 }
 0x1be   : > { %v515_v52 = vadd.f32 %v1900_v50, %v514_v51  ;;  %v1952_v53 = vpop.f32.mrb[1].mxu1 }
 0x1c0   : > { %v518_v54 = vmax.f32 %v515_v52, 0.0 }
 0x1c2   : > { %1902 = vmatmul.mubr.msk.f32.vlgmr.msra.gmra.mrb[2].mxu0 %vm444_vm2, %v518_v54 }
 0x295   : > { %v616_v61 = vpop.f32.mrb[2].mxu0 }
 0x296   : > { %v618_v62 = vpop.f32.mrb[3].mxu0  ;;  %v2279_v8 = vadd.f32 %v616_v61, %v540_v5 }
 0x297   : > { %v619_v63 = vadd.f32 %v618_v62, %v544_v60  ;;  %v2090_v62 = vmov 4  }
 0x299   : > { %v621_v0 = vmul.f32 1.442695, %v619_v63  ;;  %v2091_v63 = vmov 5  }
 0x29b   : > { %2064 = vpow2.f32 %v621_v0 }
 0x2a5   : > { %v2065_v1 = vpop.eup %2064 }
 0x2a6   : > { %1956 = vmatmul.mubr.msk.f32.vlgmr.msra.gmra.mrb[2].mxu1 %vm624_vm3, %v2065_v1 }
 0x379   : > { %v694_v10 = vpop.f32.mrb[2].mxu1 }
 0x37a   : > { %v698_v11 = vadd.f32 %v694_v10, %v2279_v8  ;;  %700 = vrot.lane.b32.xlu0 %v694_v10, %s2078_s13  ;;  %v1957_v12 = vpop.f32.mrb[3].mxu1 }
 0x37c   : > { %704 = vst.msk [vmem:[%s335_s12] sm:$0xff] %vm444_vm2, %v698_v11  ;;  %v706_v13 = vcombine.high %v698_v11, %v698_v11  ;;  %v713_v14 = vrot.slane %v698_v11, %v2282_v9 }
 0x37e   : > { %v720_v15 = vrot.slane %v706_v13, %v2282_v9  ;;  %v721_v16 = vcombine.high %v713_v14, %v713_v14  ;;  %v729_v17 = vrot.slane %v713_v14, %v2282_v9 }
 0x380   : > { %v722_v18 = vcombine.high %v720_v15, %v720_v15  ;;  %v736_v19 = vrot.slane %v720_v15, %v2282_v9  ;;  %v743_v20 = vrot.slane %v721_v16, %v2282_v9  ;;  %v751_v21 = vcombine.high %v729_v17, %v729_v17  ;;  %764 = vst.msk [vmem:[#allocation2] sm:$0x1] %vm763_vm4, %v729_v17 }
 0x381   : > { %v775_v22 = vrot.slane %v729_v17, %v2276_v2 }
 0x382   : > { %v750_v23 = vrot.slane %v722_v18, %v2282_v9  ;;  %v2300_v24 = vcombine.high %v736_v19, %v736_v19  ;;  %v753_v25 = vcombine.high %v743_v20, %v743_v20  ;;  %765 = vst.msk [vmem:[#allocation2 + $0x8] sm:$0x1] %vm763_vm4, %v743_v20  ;;  %766 = vst.msk [vmem:[#allocation2 + $0x10] sm:$0x1] %vm763_vm4, %v751_v21 }
 0x383   : > { %768 = vst.msk [vmem:[#allocation2 + $0x20] sm:$0x1] %vm763_vm4, %v736_v19  ;;  %836 = vrot.lane.b32.xlu1 %v775_v22, %s2079_s27  ;;  %804 = vrot.lane.b32.xlu0 %v775_v22, %s2080_s28  ;;  %v779_v27 = vrot.slane %v743_v20, %v2276_v2  ;;  %v783_v30 = vrot.slane %v751_v21, %v2276_v2 }
 0x384   : > { %v754_v26 = vcombine.high %v750_v23, %v750_v23  ;;  %767 = vst.msk [vmem:[#allocation2 + $0x18] sm:$0x1] %vm763_vm4, %v753_v25  ;;  %769 = vst.msk [vmem:[#allocation2 + $0x28] sm:$0x1] %vm763_vm4, %v750_v23  ;;  %v787_v31 = vrot.slane %v753_v25, %v2276_v2  ;;  %v791_v32 = vrot.slane %v736_v19, %v2276_v2 }
 0x385   : > { %770 = vst.msk [vmem:[#allocation2 + $0x30] sm:$0x1] %vm763_vm4, %v2300_v24  ;;  %v795_v33 = vrot.slane %v750_v23, %v2276_v2  ;;  %v799_v34 = vrot.slane %v2300_v24, %v2276_v2 }
 0x386   : > { %771 = vst.msk [vmem:[#allocation2 + $0x38] sm:$0x1] %vm763_vm4, %v754_v26  ;;  %v803_v35 = vrot.slane %v754_v26, %v2276_v2 }
 0x387   : > { %868 = vrot.lane.b32.xlu1 %v775_v22, %s2081_s14  ;;  %838 = vrot.lane.b32.xlu0 %v779_v27, %s2079_s27 }
 0x38b   : > { %900 = vrot.lane.b32.xlu1 %v775_v22, %s2082_s15  ;;  %870 = vrot.lane.b32.xlu0 %v779_v27, %s2081_s14 }
 0x38f   : > { %932 = vrot.lane.b32.xlu1 %v775_v22, %s2083_s16  ;;  %902 = vrot.lane.b32.xlu0 %v779_v27, %s2082_s15 }
 0x393   : > { %964 = vrot.lane.b32.xlu1 %v775_v22, %s2086_s17  ;;  %934 = vrot.lane.b32.xlu0 %v779_v27, %s2083_s16 }
 0x397   : > { %996 = vrot.lane.b32.xlu1 %v775_v22, %s2087_s18  ;;  %966 = vrot.lane.b32.xlu0 %v779_v27, %s2086_s17 }
 0x39b   : > { %998 = vrot.lane.b32.xlu0 %v779_v27, %s2087_s18  ;;  %806 = vrot.lane.b32.xlu1 %v779_v27, %s2080_s28 }
 0x39f   : > { %808 = vrot.lane.b32.xlu1 %v783_v30, %s2080_s28  ;;  %810 = vrot.lane.b32.xlu0 %v787_v31, %s2080_s28 }
 0x3a3   : > { %812 = vrot.lane.b32.xlu1 %v791_v32, %s2080_s28  ;;  %814 = vrot.lane.b32.xlu0 %v795_v33, %s2080_s28 }
 0x3a7   : > { %840 = vrot.lane.b32.xlu1 %v783_v30, %s2079_s27  ;;  %842 = vrot.lane.b32.xlu0 %v787_v31, %s2079_s27 }
 0x3ab   : > { %844 = vrot.lane.b32.xlu1 %v791_v32, %s2079_s27  ;;  %846 = vrot.lane.b32.xlu0 %v795_v33, %s2079_s27 }
 0x3af   : > { %872 = vrot.lane.b32.xlu1 %v783_v30, %s2081_s14  ;;  %874 = vrot.lane.b32.xlu0 %v787_v31, %s2081_s14 }
 0x3b3   : > { %876 = vrot.lane.b32.xlu1 %v791_v32, %s2081_s14  ;;  %878 = vrot.lane.b32.xlu0 %v795_v33, %s2081_s14 }
 0x3b7   : > { %904 = vrot.lane.b32.xlu1 %v783_v30, %s2082_s15  ;;  %906 = vrot.lane.b32.xlu0 %v787_v31, %s2082_s15 }
 0x3bb   : > { %908 = vrot.lane.b32.xlu1 %v791_v32, %s2082_s15  ;;  %910 = vrot.lane.b32.xlu0 %v795_v33, %s2082_s15 }
 0x3bf   : > { %936 = vrot.lane.b32.xlu1 %v783_v30, %s2083_s16  ;;  %938 = vrot.lane.b32.xlu0 %v787_v31, %s2083_s16 }
 0x3c3   : > { %940 = vrot.lane.b32.xlu1 %v791_v32, %s2083_s16  ;;  %942 = vrot.lane.b32.xlu0 %v795_v33, %s2083_s16 }
 0x3c7   : > { %968 = vrot.lane.b32.xlu1 %v783_v30, %s2086_s17  ;;  %970 = vrot.lane.b32.xlu0 %v787_v31, %s2086_s17 }
 0x3cb   : > { %972 = vrot.lane.b32.xlu1 %v791_v32, %s2086_s17  ;;  %974 = vrot.lane.b32.xlu0 %v795_v33, %s2086_s17 }
 0x3cf   : > { %1000 = vrot.lane.b32.xlu1 %v783_v30, %s2087_s18  ;;  %1002 = vrot.lane.b32.xlu0 %v787_v31, %s2087_s18 }
 0x3d3   : > { %1004 = vrot.lane.b32.xlu1 %v791_v32, %s2087_s18  ;;  %1006 = vrot.lane.b32.xlu0 %v795_v33, %s2087_s18 }
 0x3d7   : > { %816 = vrot.lane.b32.xlu1 %v799_v34, %s2080_s28  ;;  %818 = vrot.lane.b32.xlu0 %v803_v35, %s2080_s28 }
 0x3db   : > { %848 = vrot.lane.b32.xlu1 %v799_v34, %s2079_s27  ;;  %850 = vrot.lane.b32.xlu0 %v803_v35, %s2079_s27 }
 0x3df   : > { %880 = vrot.lane.b32.xlu1 %v799_v34, %s2081_s14  ;;  %882 = vrot.lane.b32.xlu0 %v803_v35, %s2081_s14 }
 0x3e3   : > { %912 = vrot.lane.b32.xlu1 %v799_v34, %s2082_s15  ;;  %914 = vrot.lane.b32.xlu0 %v803_v35, %s2082_s15 }
 0x3e7   : > { %944 = vrot.lane.b32.xlu1 %v799_v34, %s2083_s16  ;;  %946 = vrot.lane.b32.xlu0 %v803_v35, %s2083_s16 }
 0x3eb   : > { %976 = vrot.lane.b32.xlu1 %v799_v34, %s2086_s17  ;;  %978 = vrot.lane.b32.xlu0 %v803_v35, %s2086_s17 }
 0x3ec   : > { %v2376_v36 = vpop.permute.xlu0 %700 }
 0x3ef   : > { %1008 = vrot.lane.b32.xlu1 %v799_v34, %s2087_s18  ;;  %1010 = vrot.lane.b32.xlu0 %v803_v35, %s2087_s18 }
 0x3f5   : > { %v837_v37 = vpop.permute.xlu1 %836  ;;  %v805_v38 = vpop.permute.xlu0 %804 }
 0x3f6   : > { %860 = vst.msk [vmem:[#allocation2 + $0x2] sm:$0x1] %vm763_vm4, %v837_v37  ;;  %828 = vst.msk [vmem:[#allocation2 + $0x1] sm:$0x1] %vm763_vm4, %v805_v38 }
 0x3f9   : > { %v869_v39 = vpop.permute.xlu1 %868  ;;  %v839_v40 = vpop.permute.xlu0 %838 }
 0x3fa   : > { %892 = vst.msk [vmem:[#allocation2 + $0x3] sm:$0x1] %vm763_vm4, %v869_v39  ;;  %861 = vst.msk [vmem:[#allocation2 + $0xa] sm:$0x1] %vm763_vm4, %v839_v40 }
 0x3fd   : > { %v901_v41 = vpop.permute.xlu1 %900  ;;  %v871_v42 = vpop.permute.xlu0 %870 }
 0x3fe   : > { %924 = vst.msk [vmem:[#allocation2 + $0x4] sm:$0x1] %vm763_vm4, %v901_v41  ;;  %893 = vst.msk [vmem:[#allocation2 + $0xb] sm:$0x1] %vm763_vm4, %v871_v42 }
 0x401   : > { %v933_v43 = vpop.permute.xlu1 %932  ;;  %v903_v44 = vpop.permute.xlu0 %902 }
 0x402   : > { %956 = vst.msk [vmem:[#allocation2 + $0x5] sm:$0x1] %vm763_vm4, %v933_v43  ;;  %925 = vst.msk [vmem:[#allocation2 + $0xc] sm:$0x1] %vm763_vm4, %v903_v44 }
 0x405   : > { %v965_v45 = vpop.permute.xlu1 %964  ;;  %v935_v46 = vpop.permute.xlu0 %934 }
 0x406   : > { %988 = vst.msk [vmem:[#allocation2 + $0x6] sm:$0x1] %vm763_vm4, %v965_v45  ;;  %957 = vst.msk [vmem:[#allocation2 + $0xd] sm:$0x1] %vm763_vm4, %v935_v46 }
 0x409   : > { %v997_v47 = vpop.permute.xlu1 %996  ;;  %v967_v48 = vpop.permute.xlu0 %966 }
 0x40a   : > { %1020 = vst.msk [vmem:[#allocation2 + $0x7] sm:$0x1] %vm763_vm4, %v997_v47  ;;  %989 = vst.msk [vmem:[#allocation2 + $0xe] sm:$0x1] %vm763_vm4, %v967_v48 }
 0x40d   : > { %v999_v49 = vpop.permute.xlu0 %998  ;;  %v807_v50 = vpop.permute.xlu1 %806 }
 0x40e   : > { %1021 = vst.msk [vmem:[#allocation2 + $0xf] sm:$0x1] %vm763_vm4, %v999_v49  ;;  %829 = vst.msk [vmem:[#allocation2 + $0x9] sm:$0x1] %vm763_vm4, %v807_v50 }
 0x411   : > { %v809_v51 = vpop.permute.xlu1 %808  ;;  %v811_v52 = vpop.permute.xlu0 %810  ;;  %v1028_v53 = vld [vmem:[#allocation2] sm:$0xff] }
 0x412   : > { %830 = vst.msk [vmem:[#allocation2 + $0x11] sm:$0x1] %vm763_vm4, %v809_v51  ;;  %831 = vst.msk [vmem:[#allocation2 + $0x19] sm:$0x1] %vm763_vm4, %v811_v52  ;;  %1095 = vperm.xlu1 %2020, %v1028_v53   ;;  %1190 = vperm.xlu0 %2021, %v1028_v53   ;;  %v703_v52 = vadd.f32 %v2376_v36, %v2279_v8 }
 0x415   : > { %v813_v54 = vpop.permute.xlu1 %812  ;;  %v815_v55 = vpop.permute.xlu0 %814  ;;  %v2409_v12 = vld [vmem:[#allocation2 + $0x8] sm:$0xff] }
 0x416   : > { %832 = vst.msk [vmem:[#allocation2 + $0x21] sm:$0x1] %vm763_vm4, %v813_v54  ;;  %833 = vst.msk [vmem:[#allocation2 + $0x29] sm:$0x1] %vm763_vm4, %v815_v55  ;;  %2022 = vset.pattern.permute.xlu1 %v2088_v58  ;;  %2023 = vset.pattern.permute.xlu0 %v2089_v59 }
 0x417   : > { %1270 = vperm.xlu1 %2022, %v1028_v53   ;;  %1350 = vperm.xlu0 %2023, %v1028_v53  }
 0x419   : > { %v841_v60 = vpop.permute.xlu1 %840  ;;  %v843_v61 = vpop.permute.xlu0 %842 }
 0x41a   : > { %862 = vst.msk [vmem:[#allocation2 + $0x12] sm:$0x1] %vm763_vm4, %v841_v60  ;;  %863 = vst.msk [vmem:[#allocation2 + $0x1a] sm:$0x1] %vm763_vm4, %v843_v61 }
 0x41b   : > { %2024 = vset.pattern.permute.xlu1 %v2090_v62  ;;  %2025 = vset.pattern.permute.xlu0 %v2091_v63 }
 0x41c   : > { %1430 = vperm.xlu1 %2024, %v1028_v53   ;;  %1510 = vperm.xlu0 %2025, %v1028_v53  }
 0x41d   : > { %v845_v0 = vpop.permute.xlu1 %844  ;;  %v847_v1 = vpop.permute.xlu0 %846 }
 0x41e   : > { %864 = vst.msk [vmem:[#allocation2 + $0x22] sm:$0x1] %vm763_vm4, %v845_v0  ;;  %865 = vst.msk [vmem:[#allocation2 + $0x2a] sm:$0x1] %vm763_vm4, %v847_v1 }
 0x420   : > { %2026 = vset.pattern.permute.xlu1 %v2092_v3  ;;  %2027 = vset.pattern.permute.xlu0 %v2093_v4 }
 0x421   : > { %v873_v5 = vpop.permute.xlu1 %872  ;;  %1590 = vperm.xlu1 %2026, %v1028_v53   ;;  %v875_v7 = vpop.permute.xlu0 %874  ;;  %1670 = vperm.xlu0 %2027, %v1028_v53   ;;  %v1051_v53 = vrot.slane %v703_v52, %v2282_v9 }
 0x422   : > { %894 = vst.msk [vmem:[#allocation2 + $0x13] sm:$0x1] %vm763_vm4, %v873_v5  ;;  %895 = vst.msk [vmem:[#allocation2 + $0x1b] sm:$0x1] %vm763_vm4, %v875_v7 }
 0x423   : > { %v1059_v5 = vcombine.high %v1051_v53, %v1051_v53 }
 0x425   : > { %v877_v10 = vpop.permute.xlu1 %876  ;;  %v879_v11 = vpop.permute.xlu0 %878  ;;  %2028 = vset.pattern.permute.xlu0 %v2085_v29  ;;  %2029 = vset.pattern.permute.xlu1 %v2085_v29 }
 0x426   : > { %896 = vst.msk [vmem:[#allocation2 + $0x23] sm:$0x1] %vm763_vm4, %v877_v10  ;;  %897 = vst.msk [vmem:[#allocation2 + $0x2b] sm:$0x1] %vm763_vm4, %v879_v11  ;;  %1100 = vperm.xlu0 %2028, %v2409_v12  }
 0x429   : > { %v905_v13 = vpop.permute.xlu1 %904  ;;  %v907_v14 = vpop.permute.xlu0 %906 }
 0x42a   : > { %926 = vst.msk [vmem:[#allocation2 + $0x14] sm:$0x1] %vm763_vm4, %v905_v13  ;;  %927 = vst.msk [vmem:[#allocation2 + $0x1c] sm:$0x1] %vm763_vm4, %v907_v14 }
 0x42d   : > { %v909_v15 = vpop.permute.xlu1 %908  ;;  %v911_v16 = vpop.permute.xlu0 %910 }
 0x42e   : > { %928 = vst.msk [vmem:[#allocation2 + $0x24] sm:$0x1] %vm763_vm4, %v909_v15  ;;  %929 = vst.msk [vmem:[#allocation2 + $0x2c] sm:$0x1] %vm763_vm4, %v911_v16  ;;  %v1044_v15 = vcombine.high %v703_v52, %v703_v52 }
 0x431   : > { %v937_v17 = vpop.permute.xlu1 %936  ;;  %v939_v18 = vpop.permute.xlu0 %938 }
 0x432   : > { %958 = vst.msk [vmem:[#allocation2 + $0x15] sm:$0x1] %vm763_vm4, %v937_v17  ;;  %959 = vst.msk [vmem:[#allocation2 + $0x1d] sm:$0x1] %vm763_vm4, %v939_v18  ;;  %v2542_v17 = vrot.slane %v1044_v15, %v2282_v9 }
 0x435   : > { %v941_v19 = vpop.permute.xlu1 %940  ;;  %v943_v20 = vpop.permute.xlu0 %942 }
 0x436   : > { %960 = vst.msk [vmem:[#allocation2 + $0x25] sm:$0x1] %vm763_vm4, %v941_v19  ;;  %961 = vst.msk [vmem:[#allocation2 + $0x2d] sm:$0x1] %vm763_vm4, %v943_v20 }
 0x439   : > { %v969_v21 = vpop.permute.xlu1 %968  ;;  %v971_v22 = vpop.permute.xlu0 %970 }
 0x43a   : > { %990 = vst.msk [vmem:[#allocation2 + $0x16] sm:$0x1] %vm763_vm4, %v969_v21  ;;  %991 = vst.msk [vmem:[#allocation2 + $0x1e] sm:$0x1] %vm763_vm4, %v971_v22 }
 0x43d   : > { %v973_v23 = vpop.permute.xlu1 %972  ;;  %v975_v24 = vpop.permute.xlu0 %974 }
 0x43e   : > { %992 = vst.msk [vmem:[#allocation2 + $0x26] sm:$0x1] %vm763_vm4, %v973_v23  ;;  %993 = vst.msk [vmem:[#allocation2 + $0x2e] sm:$0x1] %vm763_vm4, %v975_v24 }
 0x441   : > { %v1001_v25 = vpop.permute.xlu1 %1000  ;;  %v1003_v26 = vpop.permute.xlu0 %1002 }
 0x442   : > { %1022 = vst.msk [vmem:[#allocation2 + $0x17] sm:$0x1] %vm763_vm4, %v1001_v25  ;;  %1023 = vst.msk [vmem:[#allocation2 + $0x1f] sm:$0x1] %vm763_vm4, %v1003_v26 }
 0x445   : > { %v1005_v27 = vpop.permute.xlu1 %1004  ;;  %v1007_v30 = vpop.permute.xlu0 %1006 }
 0x446   : > { %1024 = vst.msk [vmem:[#allocation2 + $0x27] sm:$0x1] %vm763_vm4, %v1005_v27  ;;  %1025 = vst.msk [vmem:[#allocation2 + $0x2f] sm:$0x1] %vm763_vm4, %v1007_v30 }
 0x449   : > { %v817_v31 = vpop.permute.xlu1 %816  ;;  %v819_v32 = vpop.permute.xlu0 %818  ;;  %v2431_v33 = vld [vmem:[#allocation2 + $0x10] sm:$0xff]  ;;  %v1031_v49 = vld [vmem:[#allocation2 + $0x18] sm:$0xff] }
 0x44a   : > { %834 = vst.msk [vmem:[#allocation2 + $0x31] sm:$0x1] %vm763_vm4, %v817_v31  ;;  %835 = vst.msk [vmem:[#allocation2 + $0x39] sm:$0x1] %vm763_vm4, %v819_v32  ;;  %1105 = vperm.xlu1 %2029, %v2431_v33  }
 0x44d   : > { %v849_v34 = vpop.permute.xlu1 %848  ;;  %v851_v35 = vpop.permute.xlu0 %850  ;;  %v2436_v37 = vld [vmem:[#allocation2 + $0x20] sm:$0xff]  ;;  %v1033_v50 = vld [vmem:[#allocation2 + $0x28] sm:$0xff] }
 0x44e   : > { %866 = vst.msk [vmem:[#allocation2 + $0x32] sm:$0x1] %vm763_vm4, %v849_v34  ;;  %867 = vst.msk [vmem:[#allocation2 + $0x3a] sm:$0x1] %vm763_vm4, %v851_v35  ;;  %2030 = vset.pattern.permute.xlu1 %v2084_v28  ;;  %1115 = vperm.xlu0 %2028, %v2436_v37  }
 0x44f   : > { %1194 = vperm.xlu1 %2030, %v2409_v12  }
 0x451   : > { %v881_v38 = vpop.permute.xlu1 %880  ;;  %v883_v39 = vpop.permute.xlu0 %882 }
 0x452   : > { %898 = vst.msk [vmem:[#allocation2 + $0x33] sm:$0x1] %vm763_vm4, %v881_v38  ;;  %899 = vst.msk [vmem:[#allocation2 + $0x3b] sm:$0x1] %vm763_vm4, %v883_v39  ;;  %2031 = vset.pattern.permute.xlu0 %v2088_v58 }
 0x453   : > { %1198 = vperm.xlu1 %2030, %v2431_v33   ;;  %1274 = vperm.xlu0 %2031, %v2409_v12  }
 0x455   : > { %v913_v40 = vpop.permute.xlu1 %912  ;;  %v915_v41 = vpop.permute.xlu0 %914 }
 0x456   : > { %930 = vst.msk [vmem:[#allocation2 + $0x34] sm:$0x1] %vm763_vm4, %v913_v40  ;;  %931 = vst.msk [vmem:[#allocation2 + $0x3c] sm:$0x1] %vm763_vm4, %v915_v41 }
 0x457   : > { %1206 = vperm.xlu1 %2030, %v2436_v37   ;;  %1286 = vperm.xlu0 %2031, %v2436_v37  }
 0x459   : > { %v945_v42 = vpop.permute.xlu1 %944  ;;  %v947_v43 = vpop.permute.xlu0 %946 }
 0x45a   : > { %962 = vst.msk [vmem:[#allocation2 + $0x35] sm:$0x1] %vm763_vm4, %v945_v42  ;;  %963 = vst.msk [vmem:[#allocation2 + $0x3d] sm:$0x1] %vm763_vm4, %v947_v43 }
 0x45b   : > { %2032 = vset.pattern.permute.xlu1 %v2088_v58  ;;  %2034 = vset.pattern.permute.xlu0 %v2090_v62 }
 0x45c   : > { %1278 = vperm.xlu1 %2032, %v2431_v33   ;;  %1434 = vperm.xlu0 %2034, %v2409_v12  }
 0x45d   : > { %v977_v44 = vpop.permute.xlu1 %976  ;;  %v979_v45 = vpop.permute.xlu0 %978 }
 0x45e   : > { %994 = vst.msk [vmem:[#allocation2 + $0x36] sm:$0x1] %vm763_vm4, %v977_v44  ;;  %995 = vst.msk [vmem:[#allocation2 + $0x3e] sm:$0x1] %vm763_vm4, %v979_v45 }
 0x460   : > { %2033 = vset.pattern.permute.xlu1 %v2089_v59  ;;  %1446 = vperm.xlu0 %2034, %v2436_v37  }
 0x461   : > { %1354 = vperm.xlu1 %2033, %v2409_v12   ;;  %v1009_v46 = vpop.permute.xlu1 %1008  ;;  %v1011_v47 = vpop.permute.xlu0 %1010 }
 0x462   : > { %1026 = vst.msk [vmem:[#allocation2 + $0x37] sm:$0x1] %vm763_vm4, %v1009_v46  ;;  %1027 = vst.msk [vmem:[#allocation2 + $0x3f] sm:$0x1] %vm763_vm4, %v1011_v47 }
 0x464   : > { %2037 = vset.pattern.permute.xlu0 %v2092_v3 }
 0x465   : > { %1358 = vperm.xlu1 %2033, %v2431_v33   ;;  %1594 = vperm.xlu0 %2037, %v2409_v12  }
 0x469   : > { %1366 = vperm.xlu1 %2033, %v2436_v37   ;;  %1606 = vperm.xlu0 %2037, %v2436_v37   ;;  %v2472_v48 = vld [vmem:[#allocation2 + $0x30] sm:$0xff]  ;;  %v1035_v51 = vld [vmem:[#allocation2 + $0x38] sm:$0xff] }
 0x46d   : > { %2035 = vset.pattern.permute.xlu1 %v2090_v62  ;;  %2041 = vset.pattern.permute.xlu0 %v2085_v29 }
 0x46e   : > { %1438 = vperm.xlu1 %2035, %v2431_v33   ;;  %1125 = vperm.xlu0 %2041, %v2472_v48  }
 0x472   : > { %2036 = vset.pattern.permute.xlu1 %v2091_v63  ;;  %2042 = vset.pattern.permute.xlu0 %v2084_v28 }
 0x473   : > { %1514 = vperm.xlu1 %2036, %v2409_v12   ;;  %1202 = vperm.xlu0 %2042, %v1031_v49  }
 0x477   : > { %1518 = vperm.xlu1 %2036, %v2431_v33   ;;  %1210 = vperm.xlu0 %2042, %v1033_v50  }
 0x47b   : > { %1526 = vperm.xlu1 %2036, %v2436_v37   ;;  %2045 = vset.pattern.permute.xlu0 %v2088_v58 }
 0x47c   : > { %1294 = vperm.xlu0 %2045, %v2472_v48  }
 0x47f   : > { %2038 = vset.pattern.permute.xlu1 %v2092_v3 }
 0x480   : > { %1598 = vperm.xlu1 %2038, %v2431_v33   ;;  %2046 = vset.pattern.permute.xlu0 %v2089_v59 }
 0x481   : > { %1362 = vperm.xlu0 %2046, %v1031_v49  }
 0x484   : > { %2039 = vset.pattern.permute.xlu1 %v2093_v4 }
 0x485   : > { %1674 = vperm.xlu1 %2039, %v2409_v12   ;;  %1370 = vperm.xlu0 %2046, %v1033_v50  }
 0x489   : > { %1678 = vperm.xlu1 %2039, %v2431_v33   ;;  %2049 = vset.pattern.permute.xlu0 %v2090_v62 }
 0x48a   : > { %1454 = vperm.xlu0 %2049, %v2472_v48  }
 0x48d   : > { %1686 = vperm.xlu1 %2039, %v2436_v37  }
 0x48e   : > { %2050 = vset.pattern.permute.xlu0 %v2091_v63 }
 0x48f   : > { %1522 = vperm.xlu0 %2050, %v1031_v49  }
 0x491   : > { %2040 = vset.pattern.permute.xlu1 %v2085_v29  ;;  %v2508_v54 = vpop.permute.xlu1 %1095  ;;  %v1191_v55 = vpop.permute.xlu0 %1190 }
 0x492   : > { %1110 = vperm.xlu1 %2040, %v1031_v49  }
 0x493   : > { %1530 = vperm.xlu0 %2050, %v1033_v50  }
 0x496   : > { %1120 = vperm.xlu1 %2040, %v1033_v50   ;;  %v1271_v8 = vpop.permute.xlu1 %1270  ;;  %v1351_v60 = vpop.permute.xlu0 %1350 }
 0x497   : > { %2053 = vset.pattern.permute.xlu0 %v2092_v3 }
 0x498   : > { %1614 = vperm.xlu0 %2053, %v2472_v48  }
 0x49a   : > { %2043 = vset.pattern.permute.xlu1 %v2084_v28 }
 0x49b   : > { %1214 = vperm.xlu1 %2043, %v2472_v48   ;;  %v1511_v61 = vpop.permute.xlu0 %1510  ;;  %v1431_v0 = vpop.permute.xlu1 %1430 }
 0x49c   : > { %2054 = vset.pattern.permute.xlu0 %v2093_v4 }
 0x49d   : > { %1682 = vperm.xlu0 %2054, %v1031_v49  }
 0x49f   : > { %2044 = vset.pattern.permute.xlu1 %v2088_v58 }
 0x4a0   : > { %1282 = vperm.xlu1 %2044, %v1031_v49   ;;  %v1671_v1 = vpop.permute.xlu0 %1670  ;;  %v1591_v7 = vpop.permute.xlu1 %1590 }
 0x4a1   : > { %1690 = vperm.xlu0 %2054, %v1033_v50  }
 0x4a4   : > { %1290 = vperm.xlu1 %2044, %v1033_v50  }
 0x4a5   : > { %2057 = vset.pattern.permute.xlu0 %v2084_v28  ;;  %v1067_v28 = vrot.slane %v1051_v53, %v2282_v9  ;;  %v2529_v11 = vpop.permute.xlu0 %1100 }
 0x4a6   : > { %1218 = vperm.xlu0 %2057, %v1035_v51  }
 0x4a7   : > { %v2514_v36 = vrot.slane %v1067_v28, %v2276_v2  ;;  %v1089_v18 = vcombine.high %v1067_v28, %v1067_v28 }
 0x4a8   : > { %2047 = vset.pattern.permute.xlu1 %v2089_v59 }
 0x4a9   : > { %1374 = vperm.xlu1 %2047, %v2472_v48   ;;  %v2550_v20 = vrot.slane %v1089_v18, %v2276_v2  ;;  %v1461_v30 = vmul.f32 %v1431_v0, %v2514_v36  ;;  %v1541_v34 = vmul.f32 %v1511_v61, %v2514_v36  ;;  %v1621_v38 = vmul.f32 %v1591_v7, %v2514_v36 }
 0x4aa   : > { %2059 = vset.pattern.permute.xlu0 %v2089_v59  ;;  %v1301_v59 = vmul.f32 %v1271_v8, %v2514_v36  ;;  %v1701_v41 = vmul.f32 %v1671_v1, %v2514_v36 }
 0x4ab   : > { %1378 = vperm.xlu0 %2059, %v1035_v51  }
 0x4ad   : > { %2048 = vset.pattern.permute.xlu1 %v2090_v62 }
 0x4ae   : > { %1442 = vperm.xlu1 %2048, %v1031_v49  }
 0x4af   : > { %2061 = vset.pattern.permute.xlu0 %v2091_v63 }
 0x4b0   : > { %1538 = vperm.xlu0 %2061, %v1035_v51  }
 0x4b2   : > { %1450 = vperm.xlu1 %2048, %v1033_v50  }
 0x4b4   : > { %2063 = vset.pattern.permute.xlu0 %v2093_v4 }
 0x4b5   : > { %1698 = vperm.xlu0 %2063, %v1035_v51  }
 0x4b6   : > { %2051 = vset.pattern.permute.xlu1 %v2091_v63  ;;  %v2524_v63 = vrot.slane %v1059_v5, %v2282_v9 }
 0x4b7   : > { %1534 = vperm.xlu1 %2051, %v2472_v48  }
 0x4b8   : > { %v2533_v12 = vrot.slane %v2524_v63, %v2276_v2  ;;  %v1091_v8 = vcombine.high %v2524_v63, %v2524_v63 }
 0x4b9   : > { %1317 = vrot.lane.b32.xlu0 %v1301_v59, %s2079_s27 }
 0x4ba   : > { %v2601_v5 = vrot.slane %v1091_v8, %v2276_v2 }
 0x4bb   : > { %2052 = vset.pattern.permute.xlu1 %v2092_v3 }
 0x4bc   : > { %1602 = vperm.xlu1 %2052, %v1031_v49  }
 0x4c0   : > { %1610 = vperm.xlu1 %2052, %v1033_v50  }
 0x4c4   : > { %2055 = vset.pattern.permute.xlu1 %v2093_v4 }
 0x4c5   : > { %1694 = vperm.xlu1 %2055, %v2472_v48  }
 0x4c9   : > { %v2526_v10 = vpop.permute.xlu1 %1105  ;;  %2056 = vset.pattern.permute.xlu1 %v2085_v29 }
 0x4ca   : > { %1130 = vperm.xlu1 %2056, %v1035_v51  }
 0x4cd   : > { %v2535_v13 = vpop.permute.xlu0 %1115 }
 0x4ce   : > { %v1195_v4 = vpop.permute.xlu1 %1194  ;;  %2058 = vset.pattern.permute.xlu1 %v2088_v58  ;;  %v2547_v58 = vrot.slane %v2542_v17, %v2282_v9 }
 0x4cf   : > { %v1222_v14 = vmul.f32 %v1195_v4, %v2533_v12  ;;  %1298 = vperm.xlu1 %2058, %v1035_v51  }
 0x4d0   : > { %v2557_v24 = vrot.slane %v2547_v58, %v2276_v2  ;;  %v1090_v15 = vcombine.high %v2547_v58, %v2547_v58 }
 0x4d1   : > { %1239 = vrot.lane.b32.xlu0 %v1222_v14, %s2080_s28 }
 0x4d2   : > { %v1199_v16 = vpop.permute.xlu1 %1198  ;;  %v1275_v29 = vpop.permute.xlu0 %1274  ;;  %v2620_v18 = vrot.slane %v1090_v15, %v2276_v2 }
 0x4d3   : > { %2060 = vset.pattern.permute.xlu1 %v2090_v62  ;;  %v1221_v62 = vmul.f32 %v1191_v55, %v2514_v36  ;;  %v1223_v44 = vmul.f32 %v1199_v16, %v2550_v20  ;;  %v1060_v55 = vcombine.high %v2542_v17, %v2542_v17 }
 0x4d4   : > { %1458 = vperm.xlu1 %2060, %v1035_v51  }
 0x4d5   : > { %v2598_v1 = vrot.slane %v1060_v55, %v2282_v9 }
 0x4d6   : > { %v1207_v19 = vpop.permute.xlu1 %1206  ;;  %v1287_v21 = vpop.permute.xlu0 %1286 }
 0x4d7   : > { %v1305_v25 = vmul.f32 %v1287_v21, %v2557_v24  ;;  %v1225_v47 = vmul.f32 %v1207_v19, %v2557_v24  ;;  %v2611_v9 = vrot.slane %v2598_v1, %v2276_v2 }
 0x4d8   : > { %2062 = vset.pattern.permute.xlu1 %v2092_v3  ;;  %v1381_v3 = vmul.f32 %v1351_v60, %v2514_v36 }
 0x4d9   : > { %1618 = vperm.xlu1 %2062, %v1035_v51   ;;  %v1302_v51 = vmul.f32 %v1275_v29, %v2533_v12 }
 0x4db   : > { %v1279_v22 = vpop.permute.xlu1 %1278  ;;  %v1435_v26 = vpop.permute.xlu0 %1434 }
 0x4dc   : > { %v1303_v23 = vmul.f32 %v1279_v22, %v2550_v20  ;;  %v1462_v35 = vmul.f32 %v1435_v26, %v2533_v12 }
 0x4dd   : > { %1237 = vrot.lane.b32.xlu1 %v1221_v62, %s2080_s28 }
 0x4de   : > { %1321 = vrot.lane.b32.xlu0 %v1303_v23, %s2079_s27 }
 0x4df   : > { %v1447_v33 = vpop.permute.xlu0 %1446 }
 0x4e0   : > { %v1355_v27 = vpop.permute.xlu1 %1354  ;;  %v1465_v16 = vmul.f32 %v1447_v33, %v2557_v24 }
 0x4e1   : > { %1397 = vrot.lane.b32.xlu1 %v1381_v3, %s2081_s14  ;;  %v1382_v31 = vmul.f32 %v1355_v27, %v2533_v12 }
 0x4e2   : > { %1325 = vrot.lane.b32.xlu0 %v1305_v25, %s2079_s27 }
 0x4e4   : > { %v1359_v32 = vpop.permute.xlu1 %1358  ;;  %v1595_v39 = vpop.permute.xlu0 %1594 }
 0x4e5   : > { %1477 = vrot.lane.b32.xlu1 %v1461_v30, %s2082_s15  ;;  %v1622_v48 = vmul.f32 %v1595_v39, %v2533_v12  ;;  %v1383_v53 = vmul.f32 %v1359_v32, %v2550_v20 }
 0x4e6   : > { %1399 = vrot.lane.b32.xlu0 %v1382_v31, %s2081_s14 }
 0x4e8   : > { %v1367_v37 = vpop.permute.xlu1 %1366  ;;  %v1607_v42 = vpop.permute.xlu0 %1606 }
 0x4e9   : > { %1557 = vrot.lane.b32.xlu1 %v1541_v34, %s2083_s16  ;;  %v1385_v59 = vmul.f32 %v1367_v37, %v2557_v24  ;;  %v1625_v31 = vmul.f32 %v1607_v42, %v2557_v24 }
 0x4ea   : > { %1479 = vrot.lane.b32.xlu0 %v1462_v35, %s2082_s15 }
 0x4ed   : > { %v1439_v40 = vpop.permute.xlu1 %1438  ;;  %1637 = vrot.lane.b32.xlu1 %v1621_v38, %s2086_s17  ;;  %v2582_v49 = vpop.permute.xlu0 %1125 }
 0x4ee   : > { %v1463_v7 = vmul.f32 %v1439_v40, %v2550_v20 }
 0x4f1   : > { %1717 = vrot.lane.b32.xlu1 %v1701_v41, %s2087_s18 }
 0x4f2   : > { %v1515_v43 = vpop.permute.xlu1 %1514  ;;  %v1203_v52 = vpop.permute.xlu0 %1202 }
 0x4f3   : > { %v1542_v45 = vmul.f32 %v1515_v43, %v2533_v12  ;;  %v1224_v63 = vmul.f32 %v1203_v52, %v2601_v5 }
 0x4f5   : > { %1559 = vrot.lane.b32.xlu0 %v1542_v45, %s2083_s16  ;;  %1241 = vrot.lane.b32.xlu1 %v1223_v44, %s2080_s28 }
 0x4f6   : > { %v1519_v46 = vpop.permute.xlu1 %1518  ;;  %v1211_v60 = vpop.permute.xlu0 %1210 }
 0x4f7   : > { %v1226_v17 = vmul.f32 %v1211_v60, %v2611_v9  ;;  %v1543_v19 = vmul.f32 %v1519_v46, %v2550_v20 }
 0x4f9   : > { %1639 = vrot.lane.b32.xlu0 %v1622_v48, %s2086_s17  ;;  %1245 = vrot.lane.b32.xlu1 %v1225_v47, %s2080_s28 }
 0x4fa   : > { %v1527_v50 = vpop.permute.xlu1 %1526 }
 0x4fb   : > { %v1295_v14 = vpop.permute.xlu0 %1294  ;;  %v1545_v22 = vmul.f32 %v1527_v50, %v2557_v24 }
 0x4fc   : > { %v1307_v21 = vmul.f32 %v1295_v14, %v2620_v18 }
 0x4fd   : > { %1319 = vrot.lane.b32.xlu1 %v1302_v51, %s2079_s27 }
 0x4ff   : > { %v1599_v28 = vpop.permute.xlu1 %1598 }
 0x500   : > { %v1363_v58 = vpop.permute.xlu0 %1362  ;;  %v1623_v26 = vmul.f32 %v1599_v28, %v2550_v20 }
 0x501   : > { %1401 = vrot.lane.b32.xlu1 %v1383_v53, %s2081_s14  ;;  %v1384_v23 = vmul.f32 %v1363_v58, %v2601_v5 }
 0x504   : > { %v1675_v61 = vpop.permute.xlu1 %1674  ;;  %v1371_v25 = vpop.permute.xlu0 %1370 }
 0x505   : > { %v1702_v0 = vmul.f32 %v1675_v61, %v2533_v12  ;;  %1405 = vrot.lane.b32.xlu1 %v1385_v59, %s2081_s14  ;;  %v1386_v27 = vmul.f32 %v1371_v25, %v2611_v9 }
 0x507   : > { %1719 = vrot.lane.b32.xlu0 %v1702_v0, %s2087_s18 }
 0x508   : > { %v1679_v4 = vpop.permute.xlu1 %1678 }
 0x509   : > { %1481 = vrot.lane.b32.xlu1 %v1463_v7, %s2082_s15  ;;  %v1455_v32 = vpop.permute.xlu0 %1454  ;;  %v1703_v33 = vmul.f32 %v1679_v4, %v2550_v20 }
 0x50a   : > { %v1467_v50 = vmul.f32 %v1455_v32, %v2620_v18 }
 0x50b   : > { %1243 = vrot.lane.b32.xlu0 %v1224_v63, %s2080_s28  ;;  %v1092_v63 = vcombine.high %v2598_v1, %v2598_v1 }
 0x50c   : > { %v2615_v29 = vpop.permute.xlu1 %1686 }
 0x50d   : > { %1485 = vrot.lane.b32.xlu1 %v1465_v16, %s2082_s15 }
 0x50e   : > { %v1523_v35 = vpop.permute.xlu0 %1522 }
 0x50f   : > { %1247 = vrot.lane.b32.xlu0 %v1226_v17, %s2080_s28  ;;  %v1544_v52 = vmul.f32 %v1523_v35, %v2601_v5  ;;  %v1164_v17 = vrot.slane %v1092_v63, %v2276_v2  ;;  %v1174_v63 = vmul.f32 %v2533_v12, %v2529_v11 }
 0x511   : > { %v2625_v62 = vpop.permute.xlu1 %1110  ;;  %1561 = vrot.lane.b32.xlu1 %v1543_v19, %s2083_s16 }
 0x512   : > { %v1531_v40 = vpop.permute.xlu0 %1530 }
 0x513   : > { %1329 = vrot.lane.b32.xlu0 %v1307_v21, %s2079_s27  ;;  %v1546_v55 = vmul.f32 %v1531_v40, %v2611_v9 }
 0x515   : > { %v2631_v3 = vpop.permute.xlu1 %1120  ;;  %1565 = vrot.lane.b32.xlu1 %v1545_v22, %s2083_s16 }
 0x517   : > { %1403 = vrot.lane.b32.xlu0 %v1384_v23, %s2081_s14  ;;  %v1615_v44 = vpop.permute.xlu0 %1614 }
 0x518   : > { %v1627_v59 = vmul.f32 %v1615_v44, %v2620_v18 }
 0x519   : > { %1641 = vrot.lane.b32.xlu1 %v1623_v26, %s2086_s17  ;;  %v1039_v26 = vand.u32 127, %v537_v56 }
 0x51a   : > { %v1215_v30 = vpop.permute.xlu1 %1214 }
 0x51b   : > { %1407 = vrot.lane.b32.xlu0 %v1386_v27, %s2081_s14  ;;  %v1227_v37 = vmul.f32 %v1215_v30, %v2620_v18  ;;  %v1705_v30 = vmul.f32 %v2615_v29, %v2557_v24  ;;  %vm1040_vm5 = vcmp.eq.s32.totalorder %v2268_v57, %v1039_v26  ;;  %v1173_v57 = vmul.f32 %v2514_v36, %v2508_v54 }
 0x51c   : > { %v1683_v51 = vpop.permute.xlu0 %1682 }
 0x51d   : > { %1645 = vrot.lane.b32.xlu1 %v1625_v31, %s2086_s17  ;;  %v1704_v15 = vmul.f32 %v1683_v51, %v2601_v5 }
 0x51f   : > { %v1283_v34 = vpop.permute.xlu1 %1282 }
 0x520   : > { %v1304_v39 = vmul.f32 %v1283_v34, %v2601_v5  ;;  %v1691_v8 = vpop.permute.xlu0 %1690 }
 0x521   : > { %1721 = vrot.lane.b32.xlu1 %v1703_v33, %s2087_s18  ;;  %v1706_v23 = vmul.f32 %v1691_v8, %v2611_v9  ;;  %v1904_v33 = vsel %vm1040_vm5, 1.0, %v2076_v6  ;;  %v1175_v8 = vmul.f32 %v2550_v20, %v2526_v10 }
 0x523   : > { %v1291_v38 = vpop.permute.xlu1 %1290 }
 0x524   : > { %v1306_v42 = vmul.f32 %v1291_v38, %v2611_v9 }
 0x525   : > { %1249 = vrot.lane.b32.xlu1 %v1227_v37, %s2080_s28  ;;  %v1219_v7 = vpop.permute.xlu0 %1218  ;;  %v1749_v37 = vmul.f32 1e-06, %v1904_v33 }
 0x526   : > { %v1228_v58 = vmul.f32 %v1219_v7, %v1164_v17 }
 0x528   : > { %v1375_v41 = vpop.permute.xlu1 %1374 }
 0x529   : > { %1323 = vrot.lane.b32.xlu1 %v1304_v39, %s2079_s27  ;;  %v1387_v46 = vmul.f32 %v1375_v41, %v2620_v18 }
 0x52a   : > { %v1379_v16 = vpop.permute.xlu0 %1378 }
 0x52b   : > { %v1388_v2 = vmul.f32 %v1379_v16, %v1164_v17 }
 0x52d   : > { %v1443_v43 = vpop.permute.xlu1 %1442  ;;  %1327 = vrot.lane.b32.xlu1 %v1306_v42, %s2079_s27 }
 0x52e   : > { %v1464_v45 = vmul.f32 %v1443_v43, %v2601_v5 }
 0x52f   : > { %v1539_v22 = vpop.permute.xlu0 %1538 }
 0x530   : > { %1483 = vrot.lane.b32.xlu0 %v1464_v45, %s2082_s15  ;;  %v1548_v29 = vmul.f32 %v1539_v22, %v1164_v17 }
 0x531   : > { %v1451_v47 = vpop.permute.xlu1 %1450  ;;  %1409 = vrot.lane.b32.xlu1 %v1387_v46, %s2081_s14 }
 0x532   : > { %v1466_v48 = vmul.f32 %v1451_v47, %v2611_v9 }
 0x534   : > { %1487 = vrot.lane.b32.xlu0 %v1466_v48, %s2082_s15  ;;  %v1699_v27 = vpop.permute.xlu0 %1698 }
 0x535   : > { %1489 = vrot.lane.b32.xlu1 %v1467_v50, %s2082_s15  ;;  %v1708_v45 = vmul.f32 %v1699_v27, %v1164_v17 }
 0x536   : > { %v1535_v53 = vpop.permute.xlu1 %1534 }
 0x537   : > { %v1547_v28 = vmul.f32 %v1535_v53, %v2620_v18 }
 0x538   : > { %1563 = vrot.lane.b32.xlu0 %v1544_v52, %s2083_s16  ;;  %v1318_v34 = vpop.permute.xlu0 %1317 }
 0x539   : > { %1569 = vrot.lane.b32.xlu1 %v1547_v28, %s2083_s16 }
 0x53b   : > { %v1603_v60 = vpop.permute.xlu1 %1602 }
 0x53c   : > { %1567 = vrot.lane.b32.xlu0 %v1546_v55, %s2083_s16  ;;  %v1624_v61 = vmul.f32 %v1603_v60, %v2601_v5 }
 0x53d   : > { %1649 = vrot.lane.b32.xlu1 %v1627_v59, %s2086_s17 }
 0x53f   : > { %v1611_v0 = vpop.permute.xlu1 %1610 }
 0x540   : > { %1643 = vrot.lane.b32.xlu0 %v1624_v61, %s2086_s17  ;;  %v1626_v4 = vmul.f32 %v1611_v0, %v2611_v9  ;;  %v1177_v0 = vmul.f32 %v2557_v24, %v2535_v13 }
 0x543   : > { %v1240_v38 = vpop.permute.xlu0 %1239 }
 0x544   : > { %v1695_v14 = vpop.permute.xlu1 %1694  ;;  %1647 = vrot.lane.b32.xlu0 %v1626_v4, %s2086_s17 }
 0x545   : > { %v1707_v56 = vmul.f32 %v1695_v14, %v2620_v18 }
 0x548   : > { %1723 = vrot.lane.b32.xlu0 %v1704_v15, %s2087_s18  ;;  %v1262_v15 = vadd.f32 %v1240_v38, %v1174_v63 }
 0x549   : > { %v1131_v19 = vpop.permute.xlu1 %1130 }
 0x54a   : > { %v2674_v21 = vmul.f32 %v1164_v17, %v1131_v19 }
 0x54c   : > { %1251 = vrot.lane.b32.xlu0 %v1228_v58, %s2080_s28 }
 0x54e   : > { %v1299_v1 = vpop.permute.xlu1 %1298 }
 0x54f   : > { %v1308_v25 = vmul.f32 %v1299_v1, %v1164_v17 }
 0x550   : > { %1727 = vrot.lane.b32.xlu0 %v1706_v23, %s2087_s18  ;;  %v1322_v42 = vpop.permute.xlu0 %1321 }
 0x551   : > { %1331 = vrot.lane.b32.xlu1 %v1308_v25, %s2079_s27 }
 0x553   : > { %v1459_v31 = vpop.permute.xlu1 %1458 }
 0x554   : > { %1411 = vrot.lane.b32.xlu0 %v1388_v2, %s2081_s14  ;;  %v1468_v32 = vmul.f32 %v1459_v31, %v1164_v17  ;;  %v1326_v54 = vpop.permute.xlu0 %1325 }
 0x555   : > { %1725 = vrot.lane.b32.xlu1 %v1705_v30, %s2087_s18 }
 0x558   : > { %1491 = vrot.lane.b32.xlu0 %v1468_v32, %s2082_s15  ;;  %v1619_v35 = vpop.permute.xlu1 %1618  ;;  %v1400_v50 = vpop.permute.xlu0 %1399 }
 0x559   : > { %1729 = vrot.lane.b32.xlu1 %v1707_v56, %s2087_s18  ;;  %v1628_v6 = vmul.f32 %v1619_v35, %v1164_v17 }
 0x55c   : > { %1571 = vrot.lane.b32.xlu0 %v1548_v29, %s2083_s16  ;;  %v1238_v39 = vpop.permute.xlu1 %1237  ;;  %v1480_v55 = vpop.permute.xlu0 %1479 }
 0x55d   : > { %v1261_v40 = vadd.f32 %v1238_v39, %v1173_v57  ;;  %1751 = vrot.lane.b32.xlu1 %v1749_v37, %s2078_s13 }
 0x55f   : > { %v1341_v41 = vadd.f32 %v1318_v34, %v1261_v40 }
 0x560   : > { %1651 = vrot.lane.b32.xlu0 %v1628_v6, %s2086_s17  ;;  %v1398_v43 = vpop.permute.xlu1 %1397 }
 0x561   : > { %v1421_v44 = vadd.f32 %v1398_v43, %v1341_v41 }
 0x564   : > { %1731 = vrot.lane.b32.xlu0 %v1708_v45, %s2087_s18  ;;  %v1478_v46 = vpop.permute.xlu1 %1477 }
 0x565   : > { %v1501_v47 = vadd.f32 %v1478_v46, %v1421_v44 }
 0x567   : > { %v1560_v61 = vpop.permute.xlu0 %1559 }
 0x568   : > { %v1558_v36 = vpop.permute.xlu1 %1557 }
 0x569   : > { %v1581_v48 = vadd.f32 %v1558_v36, %v1501_v47 }
 0x56b   : > { %v1640_v17 = vpop.permute.xlu0 %1639 }
 0x56c   : > { %v1638_v51 = vpop.permute.xlu1 %1637 }
 0x56d   : > { %v1661_v52 = vadd.f32 %v1638_v51, %v1581_v48 }
 0x570   : > { %v1718_v53 = vpop.permute.xlu1 %1717 }
 0x571   : > { %v2696_v28 = vadd.f32 %v1718_v53, %v1661_v52 }
 0x574   : > { %v1242_v59 = vpop.permute.xlu1 %1241 }
 0x575   : > { %v1263_v60 = vadd.f32 %v1242_v59, %v1175_v8 }
 0x577   : > { %v1343_v7 = vadd.f32 %v1322_v42, %v1263_v60 }
 0x578   : > { %v1246_v4 = vpop.permute.xlu1 %1245 }
 0x579   : > { %v1265_v14 = vadd.f32 %v1246_v4, %v1177_v0  ;;  %v1720_v23 = vpop.permute.xlu0 %1719 }
 0x57b   : > { %v1345_v16 = vadd.f32 %v1326_v54, %v1265_v14  ;;  %v1179_v14 = vmul.f32 %v2620_v18, %v2582_v49 }
 0x57c   : > { %v1320_v19 = vpop.permute.xlu1 %1319 }
 0x57d   : > { %v1342_v58 = vadd.f32 %v1320_v19, %v1262_v15  ;;  %v1244_v24 = vpop.permute.xlu0 %1243 }
 0x57f   : > { %v1422_v22 = vadd.f32 %v1400_v50, %v1342_v58  ;;  %v1176_v50 = vmul.f32 %v2601_v5, %v2625_v62 }
 0x580   : > { %v1402_v10 = vpop.permute.xlu1 %1401 }
 0x581   : > { %v1502_v20 = vadd.f32 %v1480_v55, %v1422_v22  ;;  %v1423_v1 = vadd.f32 %v1402_v10, %v1343_v7  ;;  %v1248_v11 = vpop.permute.xlu0 %1247  ;;  %v1264_v53 = vadd.f32 %v1244_v24, %v1176_v50  ;;  %v1178_v55 = vmul.f32 %v2611_v9, %v2631_v3 }
 0x583   : > { %v1582_v25 = vadd.f32 %v1560_v61, %v1502_v20  ;;  %v1266_v61 = vadd.f32 %v1248_v11, %v1178_v55 }
 0x584   : > { %v1406_v26 = vpop.permute.xlu1 %1405 }
 0x585   : > { %v1662_v2 = vadd.f32 %v1640_v17, %v1582_v25  ;;  %v1425_v13 = vadd.f32 %v1406_v26, %v1345_v16  ;;  %v1330_v56 = vpop.permute.xlu0 %1329 }
 0x587   : > { %v1742_v27 = vadd.f32 %v1720_v23, %v1662_v2 }
 0x588   : > { %v1482_v30 = vpop.permute.xlu1 %1481 }
 0x589   : > { %v1503_v31 = vadd.f32 %v1482_v30, %v1423_v1  ;;  %v1404_v35 = vpop.permute.xlu0 %1403 }
 0x58c   : > { %v1486_v12 = vpop.permute.xlu1 %1485 }
 0x58d   : > { %v1505_v32 = vadd.f32 %v1486_v12, %v1425_v13  ;;  %v1408_v57 = vpop.permute.xlu0 %1407 }
 0x590   : > { %v1562_v33 = vpop.permute.xlu1 %1561 }
 0x591   : > { %v1583_v9 = vadd.f32 %v1562_v33, %v1503_v31 }
 0x594   : > { %v1566_v34 = vpop.permute.xlu1 %1565 }
 0x595   : > { %v1585_v18 = vadd.f32 %v1566_v34, %v1505_v32 }
 0x598   : > { %v1642_v37 = vpop.permute.xlu1 %1641 }
 0x599   : > { %v1663_v10 = vadd.f32 %v1642_v37, %v1583_v9 }
 0x59c   : > { %v1646_v29 = vpop.permute.xlu1 %1645 }
 0x59d   : > { %v1665_v31 = vadd.f32 %v1646_v29, %v1585_v18 }
 0x5a0   : > { %v1722_v38 = vpop.permute.xlu1 %1721 }
 0x5a1   : > { %v1743_v13 = vadd.f32 %v1722_v38, %v1663_v10 }
 0x5a2   : > { %v1484_v39 = vpop.permute.xlu0 %1483 }
 0x5a4   : > { %v1250_v40 = vpop.permute.xlu1 %1249 }
 0x5a5   : > { %v1267_v17 = vadd.f32 %v1250_v40, %v1179_v14 }
 0x5a6   : > { %v1488_v6 = vpop.permute.xlu0 %1487 }
 0x5a7   : > { %v1347_v20 = vadd.f32 %v1330_v56, %v1267_v17 }
 0x5a8   : > { %v1324_v41 = vpop.permute.xlu1 %1323 }
 0x5a9   : > { %v1344_v8 = vadd.f32 %v1324_v41, %v1264_v53 }
 0x5aa   : > { %v1564_v42 = vpop.permute.xlu0 %1563 }
 0x5ab   : > { %v1424_v0 = vadd.f32 %v1404_v35, %v1344_v8 }
 0x5ac   : > { %v1328_v43 = vpop.permute.xlu1 %1327 }
 0x5ad   : > { %v1346_v7 = vadd.f32 %v1328_v43, %v1266_v61  ;;  %v1504_v15 = vadd.f32 %v1484_v39, %v1424_v0 }
 0x5ae   : > { %v1568_v44 = vpop.permute.xlu0 %1567 }
 0x5af   : > { %v1426_v16 = vadd.f32 %v1408_v57, %v1346_v7  ;;  %v1584_v3 = vadd.f32 %v1564_v42, %v1504_v15 }
 0x5b0   : > { %v1410_v45 = vpop.permute.xlu1 %1409 }
 0x5b1   : > { %v1506_v22 = vadd.f32 %v1488_v6, %v1426_v16  ;;  %v1427_v24 = vadd.f32 %v1410_v45, %v1347_v20 }
 0x5b2   : > { %v1644_v46 = vpop.permute.xlu0 %1643 }
 0x5b3   : > { %v1664_v25 = vadd.f32 %v1644_v46, %v1584_v3 }
 0x5b4   : > { %v1490_v47 = vpop.permute.xlu1 %1489 }
 0x5b5   : > { %v1507_v33 = vadd.f32 %v1490_v47, %v1427_v24 }
 0x5b6   : > { %v1648_v54 = vpop.permute.xlu0 %1647 }
 0x5b8   : > { %v1570_v36 = vpop.permute.xlu1 %1569 }
 0x5ba   : > { %v1724_v48 = vpop.permute.xlu0 %1723 }
 0x5bb   : > { %v1744_v30 = vadd.f32 %v1724_v48, %v1664_v25 }
 0x5bc   : > { %v1650_v52 = vpop.permute.xlu1 %1649 }
 0x5be   : > { %v1252_v51 = vpop.permute.xlu0 %1251 }
 0x5bf   : > { %v1268_v5 = vadd.f32 %v1252_v51, %v2674_v21  ;;  %v1586_v21 = vadd.f32 %v1568_v44, %v1506_v22 }
 0x5c1   : > { %v1666_v56 = vadd.f32 %v1648_v54, %v1586_v21 }
 0x5c2   : > { %v1728_v59 = vpop.permute.xlu0 %1727 }
 0x5c3   : > { %v1332_v60 = vpop.permute.xlu1 %1331  ;;  %v1746_v39 = vadd.f32 %v1728_v59, %v1666_v56 }
 0x5c4   : > { %v1348_v58 = vadd.f32 %v1332_v60, %v1268_v5 }
 0x5c6   : > { %v1412_v4 = vpop.permute.xlu0 %1411 }
 0x5c7   : > { %v1726_v63 = vpop.permute.xlu1 %1725  ;;  %v1428_v26 = vadd.f32 %v1412_v4, %v1348_v58 }
 0x5ca   : > { %v1492_v62 = vpop.permute.xlu0 %1491 }
 0x5cb   : > { %v1730_v19 = vpop.permute.xlu1 %1729  ;;  %v1508_v11 = vadd.f32 %v1492_v62, %v1428_v26 }
 0x5ce   : > { %v1572_v23 = vpop.permute.xlu0 %1571 }
 0x5cf   : > { %v1752_v1 = vpop.permute.xlu1 %1751  ;;  %v1588_v35 = vadd.f32 %v1572_v23, %v1508_v11 }
 0x5d0   : > { %v1755_v2 = vadd.f32 %v1752_v1, %v1742_v27  ;;  %v1754_v49 = vadd.f32 %v1752_v1, %v2696_v28  ;;  %v1757_v37 = vadd.f32 %v1752_v1, %v1744_v30  ;;  %v1756_v57 = vadd.f32 %v1752_v1, %v1743_v13 }
 0x5d1   : > { %v1587_v27 = vadd.f32 %v1570_v36, %v1507_v33  ;;  %v1745_v28 = vadd.f32 %v1726_v63, %v1665_v31  ;;  %v1759_v6 = vadd.f32 %v1752_v1, %v1746_v39 }
 0x5d2   : > { %v1652_v12 = vpop.permute.xlu0 %1651  ;;  %1772 = vrot.lane.b32.xlu1 %v1755_v2, %s2078_s13  ;;  %1770 = vrot.lane.b32.xlu0 %v1754_v49, %s2078_s13 }
 0x5d3   : > { %v1668_v32 = vadd.f32 %v1652_v12, %v1588_v35  ;;  %v1667_v38 = vadd.f32 %v1650_v52, %v1587_v27  ;;  %v1758_v41 = vadd.f32 %v1752_v1, %v1745_v28 }
 0x5d5   : > { %v1747_v29 = vadd.f32 %v1730_v19, %v1667_v38 }
 0x5d6   : > { %v1732_v34 = vpop.permute.xlu0 %1731  ;;  %1776 = vrot.lane.b32.xlu1 %v1757_v37, %s2078_s13  ;;  %1774 = vrot.lane.b32.xlu0 %v1756_v57, %s2078_s13 }
 0x5d7   : > { %v1748_v40 = vadd.f32 %v1732_v34, %v1668_v32  ;;  %v1760_v43 = vadd.f32 %v1752_v1, %v1747_v29 }
 0x5d9   : > { %v1761_v42 = vadd.f32 %v1752_v1, %v1748_v40 }
 0x5da   : > { %1780 = vrot.lane.b32.xlu1 %v1759_v6, %s2078_s13  ;;  %1778 = vrot.lane.b32.xlu0 %v1758_v41, %s2078_s13 }
 0x5de   : > { %1784 = vrot.lane.b32.xlu1 %v1761_v42, %s2078_s13  ;;  %1782 = vrot.lane.b32.xlu0 %v1760_v43, %s2078_s13 }
 0x644   : > { %v1773_v44 = vpop.permute.xlu1 %1772  ;;  %v1771_v45 = vpop.permute.xlu0 %1770 }
 0x645   : > { %1795 = vst.msk [vmem:[%s340_s23 + $0x8] sm:$0xff] %vm624_vm3, %v1773_v44  ;;  %1794 = vst.msk [vmem:[%s340_s23] sm:$0xff] %vm624_vm3, %v1771_v45 }
 0x648   : > { %v1777_v46 = vpop.permute.xlu1 %1776  ;;  %v1775_v47 = vpop.permute.xlu0 %1774 }
 0x649   : > { %1797 = vst.msk [vmem:[%s340_s23 + $0x18] sm:$0xff] %vm624_vm3, %v1777_v46  ;;  %1796 = vst.msk [vmem:[%s340_s23 + $0x10] sm:$0xff] %vm624_vm3, %v1775_v47 }
 0x64c   : > { %v1781_v54 = vpop.permute.xlu1 %1780  ;;  %v1779_v36 = vpop.permute.xlu0 %1778 }
 0x64d   : > { %1799 = vst.msk [vmem:[%s340_s23 + $0x28] sm:$0xff] %vm624_vm3, %v1781_v54  ;;  %1798 = vst.msk [vmem:[%s340_s23 + $0x20] sm:$0xff] %vm624_vm3, %v1779_v36 }
 0x650   : > { %v1785_v48 = vpop.permute.xlu1 %1784  ;;  %v1783_v50 = vpop.permute.xlu0 %1782 }
 0x651   : > { %1801 = vst.msk [vmem:[%s340_s23 + $0x38] sm:$0xff] %vm624_vm3, %v1785_v48  ;;  %1800 = vst.msk [vmem:[%s340_s23 + $0x30] sm:$0xff] %vm624_vm3, %v1783_v50 }
 0x652 PF: > { %s20_s30 = sadd.s32 1, %s2072_s30  }
 0x653   : > { %p17_p5 = scmp.ge.s32.totalorder %s20_s30, 4  }
 0x655   :  { %19 = sbr.rel (!%p17_p5) target bundleno = 1 (0x1), region = 94 }

</bundles_post_ra>
